<compile_context>
chip_gen: v7x
topology: tpu7x:2x2x1
jax: 0.10.0
libtpu: 0.0.40
codegen_flags: <defaults>
</compile_context>

<pallas_src>
import functools

import jax
import jax.numpy as jnp
from jax.experimental import pallas as pl
from jax.experimental.pallas import tpu as pltpu

_LANE = 128                 # lane width
_PACK = 8                   # logical rows packed per VMEM sublane row
_HIDDEN = 64                # fixed by the module
_DEFAULT_TILE = 16384       # target logical rows per grid step (review item 1)
_MIN_PALLAS_BATCH = 1024    # below this the fused XLA path wins (review item 10)


def _round_up(x, m):
    return ((x + m - 1) // m) * m


# ----------------------------------------------------------------------------
# Generation-aware configuration (review items 1/2/3/4/8).
# ----------------------------------------------------------------------------
def _device_config():
    try:
        kind = jax.devices()[0].device_kind.lower()
    except Exception:
        kind = ""
    if "v7" in kind:
        # 64 MiB VMEM per TensorCore (grid is sharded across 2 TCs).
        return dict(vmem_budget=28 << 20, vmem_limit=44 << 20, num_tc=2,
                    bf16_eup=True)
    if "v6" in kind:
        return dict(vmem_budget=64 << 20, vmem_limit=96 << 20, num_tc=1,
                    bf16_eup=True)
    if "v5e" in kind or "v5 lite" in kind or "v5litepod" in kind:
        # 128 MiB physical but only 16 MiB default scoped -> must raise limit.
        return dict(vmem_budget=64 << 20, vmem_limit=96 << 20, num_tc=1,
                    bf16_eup=False)
    if "v5" in kind or "v4" in kind:
        # v5p / v4: megacore (2 TCs), 128 MiB VMEM; conservative on dtypes.
        return dict(vmem_budget=48 << 20, vmem_limit=64 << 20, num_tc=2,
                    bf16_eup=False)
    # Unknown device: stay within the smallest default scoped VMEM.
    return dict(vmem_budget=12 << 20, vmem_limit=None, num_tc=1,
                bf16_eup=False)


def _choose_batch_tile(batch_rows, requested, cfg, state_dim, action_dim,
                       hidden=_HIDDEN):
    """Logical-row tile: as large as the per-generation VMEM budget allows
    (amortizes the ~0.35us per-grid-step overhead), multiple of 64 so the
    packed block is sublane-aligned; only on multi-TC chips do we split the
    batch to keep the 'parallel' grid at >= 2 steps."""
    lane_pad = lambda n: _round_up(n, _LANE)
    # Conservative VMEM bytes per LOGICAL batch row in the packed layout:
    #   double-buffered f32 input + output blocks, plus ~6 live
    #   (tile//8, 8*hidden) f32 temporaries (z1/h1/z2/h2/...).
    per_row = (2 * 4 * lane_pad(_PACK * state_dim)
               + 2 * 4 * lane_pad(_PACK * action_dim)
               + 6 * 4 * _PACK * hidden) // _PACK
    reserve = 8 << 20  # block-diag weights (double-buffered) + headroom
    cap = max(_PACK * 8, (cfg["vmem_budget"] - reserve) // per_row)

    tile = min(int(requested), int(cap), _round_up(batch_rows, _PACK * 8))
    tile = max(_PACK * 8, (tile // (_PACK * 8)) * (_PACK * 8))

    # Feed both TensorCores (v7x / v4 / v5p) when the batch allows 2 steps.
    if cfg["num_tc"] > 1 and tile >= batch_rows and batch_rows >= 2 * _PACK * 8:
        tile = max(_PACK * 8, _round_up(-(-batch_rows // 2), _PACK * 8))
    return tile


# ----------------------------------------------------------------------------
# Kernel: one (tile//8, 8*state_dim) packed batch slab per grid step.
# ----------------------------------------------------------------------------
def _ppo_actor_kernel(x_ref, w1_ref, b1_ref, w2_ref, b2_ref, w3_ref, b3_ref,
                      o_ref, *, act_dtype):
    """Fused 3-layer MLP + tanh head on the lane-packed layout.

    Each packed row holds 8 logical states side by side; the weights are
    block-diagonal replicas, so row-wise independence is preserved and the
    packed output row holds the 8 corresponding action rows contiguously
    (row-major -> no output transpose needed in the wrapper).

    Matmul operands use the weights' dtype (bf16 on all generations by
    default); accumulation is always f32; tanh/bias run in `act_dtype`
    (bf16 only on v6e/v7x which have a bf16 EUP/VPU datapath).
    """
    mm = w1_ref.dtype
    x = x_ref[...].astype(mm)

    z1 = jnp.dot(x, w1_ref[...], preferred_element_type=jnp.float32) + b1_ref[...]
    h1 = jnp.tanh(z1.astype(act_dtype)).astype(mm)

    z2 = jnp.dot(h1, w2_ref[...], preferred_element_type=jnp.float32) + b2_ref[...]
    h2 = jnp.tanh(z2.astype(act_dtype)).astype(mm)

    z3 = jnp.dot(h2, w3_ref[...], preferred_element_type=jnp.float32) + b3_ref[...]
    o_ref[...] = jnp.tanh(z3).astype(o_ref.dtype)   # final tanh kept in f32


# ----------------------------------------------------------------------------
# One-time parameter preparation (hoisted out of the hot loop).
# ----------------------------------------------------------------------------
def pack_params(params, *, matmul_dtype=None, pack=_PACK):
    """Build the block-diagonal / lane-packed weights once.

    matmul_dtype defaults to bf16 (the MXU runs bf16 natively on every TPU
    generation); pass jnp.float32 for strict parity with the f32 reference.
    """
    w1, b1, w2, b2, w3, b3 = params
    if matmul_dtype is None:
        matmul_dtype = jnp.bfloat16
    eye = jnp.eye(pack, dtype=jnp.float32)

    def bdiag(w):
        return jnp.kron(eye, w).astype(matmul_dtype)   # block_diag(w, ..., w)

    def btile(b):
        return jnp.tile(b.reshape(1, -1), (1, pack)).astype(jnp.float32)

    return dict(
        pack=pack,
        state_dim=w1.shape[0], hidden=w1.shape[1], action_dim=w3.shape[1],
        w1=bdiag(w1), b1=btile(b1),
        w2=bdiag(w2), b2=btile(b2),
        w3=bdiag(w3), b3=btile(b3),
        raw=(w1, b1, w2, b2, w3, b3),   # f32 originals for the XLA fallback
    )


# ----------------------------------------------------------------------------
# Forward
# ----------------------------------------------------------------------------
def ppo_actor_forward(states, packed, *, batch_tile=_DEFAULT_TILE,
                      act_dtype=None, min_pallas_batch=_MIN_PALLAS_BATCH,
                      interpret=False):
    """Pallas wrapper: tiles over the (packed) batch dimension only; the tiny
    block-diag weights use constant-index BlockSpecs and stay VMEM-resident."""
    batch, state_dim = states.shape
    assert state_dim == packed["state_dim"]
    pack = packed["pack"]
    hidden = packed["hidden"]
    action_dim = packed["action_dim"]

    # Tiny batches: kernel launch + wrapper dispatches dominate; let XLA fuse.
    if batch < min_pallas_batch:
        return ppo_actor_forward_ref(states, packed["raw"])

    cfg = _device_config()
    if act_dtype is None:
        # bf16 tanh only where the EUP has a bf16 path, and only if the
        # matmul path is already bf16 (otherwise caller asked for parity).
        bf16_weights = packed["w1"].dtype == jnp.bfloat16
        act_dtype = jnp.bfloat16 if (cfg["bf16_eup"] and bf16_weights) else jnp.float32

    # Pad at most pack-1 rows so the free row-major reshape is valid; the
    # ragged last *grid block* is handled by Pallas itself (no big jnp.pad).
    batch8 = _round_up(batch, pack)
    if batch8 != batch:
        states = jnp.pad(states, ((0, batch8 - batch), (0, 0)))
    rows = batch8 // pack
    in_w = pack * state_dim
    hid_w = pack * hidden
    out_w = pack * action_dim
    xp = states.reshape(rows, in_w)          # contiguous -> free reshape

    tile = _choose_batch_tile(batch8, batch_tile, cfg, state_dim, action_dim,
                              hidden)
    tile_p = tile // pack
    grid = (pl.cdiv(rows, tile_p),)

    kernel = functools.partial(_ppo_actor_kernel, act_dtype=act_dtype)

    out_p = pl.pallas_call(
        kernel,
        out_shape=jax.ShapeDtypeStruct((rows, out_w), jnp.float32),
        grid_spec=pltpu.PrefetchScalarGridSpec(
            num_scalar_prefetch=0,
            grid=grid,
            in_specs=[
                pl.BlockSpec((tile_p, in_w), lambda i: (i, 0)),   # packed states
                pl.BlockSpec((in_w, hid_w), lambda i: (0, 0)),    # W1 block-diag
                pl.BlockSpec((1, hid_w), lambda i: (0, 0)),       # b1 tiled
                pl.BlockSpec((hid_w, hid_w), lambda i: (0, 0)),   # W2 block-diag
                pl.BlockSpec((1, hid_w), lambda i: (0, 0)),       # b2 tiled
                pl.BlockSpec((hid_w, out_w), lambda i: (0, 0)),   # W3 block-diag
                pl.BlockSpec((1, out_w), lambda i: (0, 0)),       # b3 tiled
            ],
            out_specs=pl.BlockSpec((tile_p, out_w), lambda i: (i, 0)),
        ),
        compiler_params=pltpu.CompilerParams(
            dimension_semantics=("parallel",),
            vmem_limit_bytes=cfg["vmem_limit"]),
        interpret=interpret,
    )(xp, packed["w1"], packed["b1"], packed["w2"], packed["b2"],
      packed["w3"], packed["b3"])

    out = out_p.reshape(batch8, action_dim)   # packed rows are row-major
    return out if batch8 == batch else out[:batch]


# ----------------------------------------------------------------------------
# Init / reference
# ----------------------------------------------------------------------------
def init_params(key, state_dim, action_dim, hidden=_HIDDEN):
    """Deterministic init mimicking torch.nn.Linear default
    (uniform(-1/sqrt(fan_in), 1/sqrt(fan_in)))."""
    ks = jax.random.split(key, 6)

    def linear(kw, kb, fan_in, fan_out):
        bound = 1.0 / jnp.sqrt(jnp.float32(fan_in))
        w = jax.random.uniform(kw, (fan_in, fan_out), jnp.float32, -bound, bound)
        b = jax.random.uniform(kb, (1, fan_out), jnp.float32, -bound, bound)
        return w, b

    w1, b1 = linear(ks[0], ks[1], state_dim, hidden)
    w2, b2 = linear(ks[2], ks[3], hidden, hidden)
    w3, b3 = linear(ks[4], ks[5], hidden, action_dim)
    # TODO(synk): self.log_stds (zeros(1, action_dim)) is only used by
    # sample()/evaluate_log_pi(), not forward(); not represented here.
    return (w1, b1, w2, b2, w3, b3)


def ppo_actor_forward_ref(states, params):
    """Pure-JAX reference (also the small-batch fast path)."""
    w1, b1, w2, b2, w3, b3 = params
    h1 = jnp.tanh(states @ w1 + b1)
    h2 = jnp.tanh(h1 @ w2 + b2)
    return jnp.tanh(h2 @ w3 + b3)


if __name__ == "__main__":
    key = jax.random.PRNGKey(0)
    k_param, k_state = jax.random.split(key)

    state_dim = 16     # state_shape = (16,)
    action_dim = 4     # action_shape = (4,)
    batch = 203        # not a multiple of 8 or 64: exercises the tiny 8-row
                       # pad AND the ragged last grid block (masked writes)

    params = init_params(k_param, state_dim, action_dim)
    states = jax.random.normal(k_state, (batch, state_dim), jnp.float32)
    ref = ppo_actor_forward_ref(states, params)

    # Strict f32 parity check of the Pallas path (force past the fallback).
    packed_f32 = pack_params(params, matmul_dtype=jnp.float32)
    out = ppo_actor_forward(states, packed_f32, act_dtype=jnp.float32,
                            min_pallas_batch=0)
    out = jax.block_until_ready(out)
    assert out.shape == (batch, action_dim)
    assert jnp.max(jnp.abs(out - ref)) < 1e-5

    # Multi-step grid (small forced tile): exercises pipelining and the
    # 2-TensorCore "parallel" split on v7x.
    out_grid = jax.block_until_ready(
        ppo_actor_forward(states, packed_f32, act_dtype=jnp.float32,
                          batch_tile=128, min_pallas_batch=0))
    assert jnp.max(jnp.abs(out_grid - ref)) < 1e-5

    # Auto dtypes: bf16 matmul operands everywhere; bf16 tanh on v6e/v7x only.
    packed_auto = pack_params(params)
    out_auto = jax.block_until_ready(
        ppo_actor_forward(states, packed_auto, min_pallas_batch=0))
    assert out_auto.shape == (batch, action_dim)
    assert jnp.max(jnp.abs(out_auto - ref)) < 3e-2   # bf16 operand rounding

    # Tiny-batch dispatch uses the fused XLA fallback.
    out_small = jax.block_until_ready(ppo_actor_forward(states[:8], packed_auto))
    assert jnp.max(jnp.abs(out_small - ref[:8])) < 1e-5

    print("KERNEL_OK")
</pallas_src>

<mosaic_0001>
module attributes {stable_mosaic.version = 11 : i64} {
  func.func @_ppo_actor_kernel(%arg0: i32, %arg1: memref<32x128xf32, #tpu.memory_space<vmem>>, %arg2: memref<128x512xf32, #tpu.memory_space<vmem>>, %arg3: memref<1x512xf32, #tpu.memory_space<vmem>>, %arg4: memref<512x512xf32, #tpu.memory_space<vmem>>, %arg5: memref<1x512xf32, #tpu.memory_space<vmem>>, %arg6: memref<512x32xf32, #tpu.memory_space<vmem>>, %arg7: memref<1x32xf32, #tpu.memory_space<vmem>>, %arg8: memref<32x32xf32, #tpu.memory_space<vmem>>) attributes {dimension_semantics = [#tpu.dimension_semantics<parallel>], iteration_bounds = array<i64: 1>, scalar_prefetch = 0 : i64, scratch_operands = 0 : i64, tpu.core_type = #tpu.core_type<tc>, window_params = [{transform_indices = @transform_0, window_bounds = array<i64: 32, 128>}, {pipeline_mode = #tpu.pipeline_mode<synchronous>, transform_indices = @transform_1, window_bounds = array<i64: 128, 512>}, {pipeline_mode = #tpu.pipeline_mode<synchronous>, transform_indices = @transform_2, window_bounds = array<i64: 1, 512>}, {pipeline_mode = #tpu.pipeline_mode<synchronous>, transform_indices = @transform_3, window_bounds = array<i64: 512, 512>}, {pipeline_mode = #tpu.pipeline_mode<synchronous>, transform_indices = @transform_4, window_bounds = array<i64: 1, 512>}, {pipeline_mode = #tpu.pipeline_mode<synchronous>, transform_indices = @transform_5, window_bounds = array<i64: 512, 32>}, {pipeline_mode = #tpu.pipeline_mode<synchronous>, transform_indices = @transform_6, window_bounds = array<i64: 1, 32>}, {transform_indices = @transform_7, window_bounds = array<i64: 32, 32>}]} {
    %c0 = arith.constant 0 : index
    %c0_0 = arith.constant 0 : index
    %0 = vector.load %arg1[%c0, %c0_0] : memref<32x128xf32, #tpu.memory_space<vmem>>, vector<32x128xf32>
    %c0_1 = arith.constant 0 : index
    %c0_2 = arith.constant 0 : index
    %1 = vector.load %arg2[%c0_1, %c0_2] : memref<128x512xf32, #tpu.memory_space<vmem>>, vector<128x512xf32>
    %cst = arith.constant dense<0.000000e+00> : vector<32x512xf32>
    %2 = tpu.matmul %0, %1, %cst {dimension_numbers = #tpu.dot_dimension_numbers<[1], [0], [0], [1], [0, 0, 1, 1], [], []>} : vector<32x128xf32>, vector<128x512xf32>, vector<32x512xf32> -> vector<32x512xf32>
    %c0_3 = arith.constant 0 : index
    %c0_4 = arith.constant 0 : index
    %3 = vector.load %arg3[%c0_3, %c0_4] : memref<1x512xf32, #tpu.memory_space<vmem>>, vector<1x512xf32>
    %4 = vector.broadcast %3 : vector<1x512xf32> to vector<32x512xf32>
    %5 = arith.addf %2, %4 : vector<32x512xf32>
    %6 = math.tanh %5 : vector<32x512xf32>
    %c0_5 = arith.constant 0 : index
    %c0_6 = arith.constant 0 : index
    %7 = vector.load %arg4[%c0_5, %c0_6] : memref<512x512xf32, #tpu.memory_space<vmem>>, vector<512x512xf32>
    %cst_7 = arith.constant dense<0.000000e+00> : vector<32x512xf32>
    %8 = tpu.matmul %6, %7, %cst_7 {dimension_numbers = #tpu.dot_dimension_numbers<[1], [0], [0], [1], [0, 0, 1, 1], [], []>} : vector<32x512xf32>, vector<512x512xf32>, vector<32x512xf32> -> vector<32x512xf32>
    %c0_8 = arith.constant 0 : index
    %c0_9 = arith.constant 0 : index
    %9 = vector.load %arg5[%c0_8, %c0_9] : memref<1x512xf32, #tpu.memory_space<vmem>>, vector<1x512xf32>
    %10 = vector.broadcast %9 : vector<1x512xf32> to vector<32x512xf32>
    %11 = arith.addf %8, %10 : vector<32x512xf32>
    %12 = math.tanh %11 : vector<32x512xf32>
    %c0_10 = arith.constant 0 : index
    %c0_11 = arith.constant 0 : index
    %13 = vector.load %arg6[%c0_10, %c0_11] : memref<512x32xf32, #tpu.memory_space<vmem>>, vector<512x32xf32>
    %cst_12 = arith.constant dense<0.000000e+00> : vector<32x32xf32>
    %14 = tpu.matmul %12, %13, %cst_12 {dimension_numbers = #tpu.dot_dimension_numbers<[1], [0], [0], [1], [0, 0, 1, 1], [], []>} : vector<32x512xf32>, vector<512x32xf32>, vector<32x32xf32> -> vector<32x32xf32>
    %c0_13 = arith.constant 0 : index
    %c0_14 = arith.constant 0 : index
    %15 = vector.load %arg7[%c0_13, %c0_14] : memref<1x32xf32, #tpu.memory_space<vmem>>, vector<1x32xf32>
    %16 = vector.broadcast %15 : vector<1x32xf32> to vector<32x32xf32>
    %17 = arith.addf %14, %16 : vector<32x32xf32>
    %18 = math.tanh %17 : vector<32x32xf32>
    %c0_15 = arith.constant 0 : index
    %c0_16 = arith.constant 0 : index
    %19 = vector.load %arg8[%c0_15, %c0_16] : memref<32x32xf32, #tpu.memory_space<vmem>>, vector<32x32xf32>
    tpu.vector_store %arg8[%c0_15, %c0_16], %18 {strides = array<i32>} : memref<32x32xf32, #tpu.memory_space<vmem>>, vector<32x32xf32>,
    return
  }
  func.func @transform_0(%arg0: i32) -> (i32, i32) {
    %c0_i32 = arith.constant 0 : i32
    %c0_i32_0 = arith.constant 0 : i32
    return %arg0, %c0_i32 : i32, i32
  }
  func.func @transform_1(%arg0: i32) -> (i32, i32) {
    %c0_i32 = arith.constant 0 : i32
    %c0_i32_0 = arith.constant 0 : i32
    %c0_i32_1 = arith.constant 0 : i32
    return %c0_i32, %c0_i32_0 : i32, i32
  }
  func.func @transform_2(%arg0: i32) -> (i32, i32) {
    %c0_i32 = arith.constant 0 : i32
    %c0_i32_0 = arith.constant 0 : i32
    %c0_i32_1 = arith.constant 0 : i32
    return %c0_i32, %c0_i32_0 : i32, i32
  }
  func.func @transform_3(%arg0: i32) -> (i32, i32) {
    %c0_i32 = arith.constant 0 : i32
    %c0_i32_0 = arith.constant 0 : i32
    %c0_i32_1 = arith.constant 0 : i32
    return %c0_i32, %c0_i32_0 : i32, i32
  }
  func.func @transform_4(%arg0: i32) -> (i32, i32) {
    %c0_i32 = arith.constant 0 : i32
    %c0_i32_0 = arith.constant 0 : i32
    %c0_i32_1 = arith.constant 0 : i32
    return %c0_i32, %c0_i32_0 : i32, i32
  }
  func.func @transform_5(%arg0: i32) -> (i32, i32) {
    %c0_i32 = arith.constant 0 : i32
    %c0_i32_0 = arith.constant 0 : i32
    %c0_i32_1 = arith.constant 0 : i32
    return %c0_i32, %c0_i32_0 : i32, i32
  }
  func.func @transform_6(%arg0: i32) -> (i32, i32) {
    %c0_i32 = arith.constant 0 : i32
    %c0_i32_0 = arith.constant 0 : i32
    %c0_i32_1 = arith.constant 0 : i32
    return %c0_i32, %c0_i32_0 : i32, i32
  }
  func.func @transform_7(%arg0: i32) -> (i32, i32) {
    %c0_i32 = arith.constant 0 : i32
    %c0_i32_0 = arith.constant 0 : i32
    return %arg0, %c0_i32 : i32, i32
  }
}

</mosaic_0001>

<bundles_post_ra>
// kernel: tpu_custom_call.1
= control target key start
LH: loop header
LB: loop body
LE: loop exit
PB: predicated region body
PF: predicated region fallthrough
CT: control target
= control target key end

     0   :  { %12 = vsyncpa [#allocation3], 0  ;;  %s2435_s0 = inlined_call_operand.vmem [shape: f32[26,128], index: 0, kind: input, shape index: {}]   ;;  %s2436_s1 = inlined_call_operand.vmem [shape: f32[128,512], index: 1, kind: input, shape index: {}]   ;;  %s2437_s2 = inlined_call_operand.vmem [shape: f32[1,512], index: 2, kind: input, shape index: {}]   ;;  %s2438_s3 = inlined_call_operand.hbm [shape: f32[512,512], index: 3, kind: input, shape index: {}]   ;;  %s2439_s4 = inlined_call_operand.vmem [shape: f32[1,512], index: 4, kind: input, shape index: {}]   ;;  %s2440_s5 = inlined_call_operand.vmem [shape: f32[512,32], index: 5, kind: input, shape index: {}]   ;;  %s2441_s6 = inlined_call_operand.vmem [shape: f32[1,32], index: 6, kind: input, shape index: {}]   ;;  %s2442_s7 = inlined_call_operand.hbm [shape: f32[26,32], index: 7, kind: output, shape index: {}]  }
   0x1   :  { %13 = vsyncpa [#allocation4], 0  ;;  %s1874_s24 = smov [#allocation2]   ;;  %s1826_s28 = scalar_lea.hbm %s2438_s3, 32768 }
   0x2   :  { %s25_s25 = sshll.u32 %s1874_s24, 4  ;;  %p1827_p0 = scmp.ne.s32.totalorder %s2438_s3, %s1826_s28  ;;  %s26_s25 = int_to_ptr.vmem [resolvable:$true] %s25_s25 }
   0x3   :  { %p1830_p1 = scmp.lt.u32.totalorder %s1826_s28, %s2438_s3 }
   0x5   :  { %p1832_p2 = pnand %p1830_p1, %p1827_p0 }
   0x7   :  { %1835 = shalt.err (!%p1832_p2)
}
   0x8   :  { %s1836_s10 = scalar_lea.vmem %s26_s25, 32768  ;;  %p1841_p4 = scmp.lt.s32.totalorder %s26_s25, %s26_s25 }
   0x9   :  { %p1837_p3 = scmp.ne.s32.totalorder %s26_s25, %s1836_s10  ;;  %p1842_p5 = scmp.lt.s32.totalorder %s1836_s10, %s1836_s10 }
   0xb   :  { %p1843_p6 = por %p1842_p5, %p1841_p4 }
   0xd   :  { %p1844_p7 = pnand %p1843_p6, %p1837_p3 }
   0xf   :  { %1847 = shalt.err (!%p1844_p7)
}
  0x10   :  { %s1875_s11 = smov 512   ;;  %s1876_s12 = smov 32  }
  0x11   :  { %31 = dma.hbm_to_vmem [thread:$0]  %s2438_s3, 32768, %s26_s25, [#allocation3], %s1875_s11, %s1875_s11, %s1876_s12  }
  0x12   :  { %1870 = dma.done.wait [#allocation3], 32768  }
  0x13   :  { %1871 = vsyncadd [#allocation3], 4294934528  ;;  %v1877_v0 = vmov 0.0   ;;  %v46_v1 = vld [vmem:[%s2436_s1 + $0x8] sm:$0xff]  ;;  %v45_v3 = vld [vmem:[%s2436_s1] sm:$0xff]  ;;  %vm1220_vm0 = vcmask 261120  }
  0x14   :  { %195 = vmatprep.mubr.f32.mxu0 %v1877_v0  ;;  %284 = vmatprep.mubr.f32.mxu1 %v1877_v0  ;;  %v50_v2 = vld [vmem:[%s2436_s1 + $0x28] sm:$0xff]  ;;  %v49_v5 = vld [vmem:[%s2436_s1 + $0x20] sm:$0xff]  ;;  %v48_v28 = vld [vmem:[%s2436_s1 + $0x18] sm:$0xff] }
  0x15   :  { %v1331_v4 = vpack.c.bf16 %v50_v2, %v46_v1  ;;  %v54_v6 = vld [vmem:[%s2436_s1 + $0x48] sm:$0xff]  ;;  %v1333_v8 = vpack.c.bf16 %v49_v5, %v45_v3  ;;  %v53_v10 = vld [vmem:[%s2436_s1 + $0x40] sm:$0xff]  ;;  %v52_v29 = vld [vmem:[%s2436_s1 + $0x38] sm:$0xff] }
  0x16   :  { %v58_v7 = vld [vmem:[%s2436_s1 + $0x68] sm:$0xff]  ;;  %v57_v11 = vld [vmem:[%s2436_s1 + $0x60] sm:$0xff]  ;;  %v47_v30 = vld [vmem:[%s2436_s1 + $0x10] sm:$0xff]  ;;  %v1363_v32 = vpack.c.bf16 %v52_v29, %v48_v28 }
  0x17   :  { %v1335_v9 = vpack.c.bf16 %v58_v7, %v54_v6  ;;  %v62_v12 = vld [vmem:[%s2436_s1 + $0x88] sm:$0xff]  ;;  %1332 = vmatprep.subr.bf16.mxu0 %v1331_v4  ;;  %v1337_v14 = vpack.c.bf16 %v57_v11, %v53_v10  ;;  %v61_v16 = vld [vmem:[%s2436_s1 + $0x80] sm:$0xff]  ;;  %v51_v33 = vld [vmem:[%s2436_s1 + $0x30] sm:$0xff] }
  0x18   :  { %v66_v13 = vld [vmem:[%s2436_s1 + $0xa8] sm:$0xff]  ;;  %1334 = vmatpush1.bf16.msra.mxu0 %v1333_v8  ;;  %v65_v17 = vld [vmem:[%s2436_s1 + $0xa0] sm:$0xff]  ;;  %v56_v34 = vld [vmem:[%s2436_s1 + $0x58] sm:$0xff]  ;;  %v1365_v37 = vpack.c.bf16 %v51_v33, %v47_v30  ;;  %1364 = vmatprep.subr.bf16.mxu1 %v1363_v32 }
  0x19   :  { %1336 = vmatprep.subr.bf16.mxu0 %v1335_v9  ;;  %v1339_v15 = vpack.c.bf16 %v66_v13, %v62_v12  ;;  %v70_v18 = vld [vmem:[%s2436_s1 + $0xc8] sm:$0xff]  ;;  %v1341_v20 = vpack.c.bf16 %v65_v17, %v61_v16  ;;  %v69_v22 = vld [vmem:[%s2436_s1 + $0xc0] sm:$0xff]  ;;  %v60_v35 = vld [vmem:[%s2436_s1 + $0x78] sm:$0xff] }
  0x1a   :  { %v74_v19 = vld [vmem:[%s2436_s1 + $0xe8] sm:$0xff]  ;;  %v73_v23 = vld [vmem:[%s2436_s1 + $0xe0] sm:$0xff]  ;;  %v1367_v38 = vpack.c.bf16 %v60_v35, %v56_v34  ;;  %v55_v39 = vld [vmem:[%s2436_s1 + $0x50] sm:$0xff]  ;;  %1366 = vmatpush1.bf16.msra.mxu1 %v1365_v37 }
  0x1b   :  { %v1343_v21 = vpack.c.bf16 %v74_v19, %v70_v18  ;;  %v78_v24 = vld [vmem:[%s2436_s1 + $0x108] sm:$0xff]  ;;  %v77_v26 = vld [vmem:[%s2436_s1 + $0x100] sm:$0xff]  ;;  %v1345_v31 = vpack.c.bf16 %v73_v23, %v69_v22  ;;  %v59_v40 = vld [vmem:[%s2436_s1 + $0x70] sm:$0xff] }
  0x1c   :  { %1338 = vmatpush1.bf16.msra.mxu0 %v1337_v14  ;;  %v82_v25 = vld [vmem:[%s2436_s1 + $0x128] sm:$0xff]  ;;  %v81_v27 = vld [vmem:[%s2436_s1 + $0x120] sm:$0xff]  ;;  %v64_v41 = vld [vmem:[%s2436_s1 + $0x98] sm:$0xff]  ;;  %v1369_v45 = vpack.c.bf16 %v59_v40, %v55_v39  ;;  %1368 = vmatprep.subr.bf16.mxu1 %v1367_v38 }
  0x1d   :  { %1340 = vmatprep.subr.bf16.mxu0 %v1339_v15  ;;  %v1347_v36 = vpack.c.bf16 %v82_v25, %v78_v24  ;;  %v86_v42 = vld [vmem:[%s2436_s1 + $0x148] sm:$0xff]  ;;  %v68_v44 = vld [vmem:[%s2436_s1 + $0xb8] sm:$0xff]  ;;  %v1349_v46 = vpack.c.bf16 %v81_v27, %v77_v26  ;;  %v85_v47 = vld [vmem:[%s2436_s1 + $0x140] sm:$0xff] }
  0x1e   :  { %v90_v43 = vld [vmem:[%s2436_s1 + $0x168] sm:$0xff]  ;;  %v1371_v48 = vpack.c.bf16 %v68_v44, %v64_v41  ;;  %v63_v49 = vld [vmem:[%s2436_s1 + $0x90] sm:$0xff]  ;;  %v89_v52 = vld [vmem:[%s2436_s1 + $0x160] sm:$0xff]  ;;  %1370 = vmatpush1.bf16.msra.mxu1 %v1369_v45 }
  0x1f   :  { %v67_v50 = vld [vmem:[%s2436_s1 + $0xb0] sm:$0xff]  ;;  %v1351_v51 = vpack.c.bf16 %v90_v43, %v86_v42  ;;  %v72_v53 = vld [vmem:[%s2436_s1 + $0xd8] sm:$0xff]  ;;  %v94_v55 = vld [vmem:[%s2436_s1 + $0x188] sm:$0xff]  ;;  %v1353_v58 = vpack.c.bf16 %v89_v52, %v85_v47 }
  0x20   :  { %1342 = vmatpush1.bf16.msra.mxu0 %v1341_v20  ;;  %v76_v54 = vld [vmem:[%s2436_s1 + $0xf8] sm:$0xff]  ;;  %v98_v56 = vld [vmem:[%s2436_s1 + $0x1a8] sm:$0xff]  ;;  %v1373_v57 = vpack.c.bf16 %v67_v50, %v63_v49  ;;  %v93_v59 = vld [vmem:[%s2436_s1 + $0x180] sm:$0xff]  ;;  %1372 = vmatprep.subr.bf16.mxu1 %v1371_v48 }
  0x21   :  { %1344 = vmatprep.subr.bf16.mxu0 %v1343_v21  ;;  %v1375_v60 = vpack.c.bf16 %v76_v54, %v72_v53  ;;  %v71_v61 = vld [vmem:[%s2436_s1 + $0xd0] sm:$0xff]  ;;  %v1355_v63 = vpack.c.bf16 %v98_v56, %v94_v55  ;;  %v97_v1 = vld [vmem:[%s2436_s1 + $0x1a0] sm:$0xff]  ;;  %v80_v2 = vld [vmem:[%s2436_s1 + $0x118] sm:$0xff] }
  0x22   :  { %v75_v62 = vld [vmem:[%s2436_s1 + $0xf0] sm:$0xff]  ;;  %v84_v3 = vld [vmem:[%s2436_s1 + $0x138] sm:$0xff]  ;;  %v102_v4 = vld [vmem:[%s2436_s1 + $0x1c8] sm:$0xff]  ;;  %1374 = vmatpush1.bf16.msra.mxu1 %v1373_v57  ;;  %v1357_v7 = vpack.c.bf16 %v97_v1, %v93_v59 }
  0x23   :  { %v106_v5 = vld [vmem:[%s2436_s1 + $0x1e8] sm:$0xff]  ;;  %v1377_v6 = vpack.c.bf16 %v75_v62, %v71_v61  ;;  %v101_v8 = vld [vmem:[%s2436_s1 + $0x1c0] sm:$0xff]  ;;  %1376 = vmatprep.subr.bf16.mxu1 %v1375_v60  ;;  %v1379_v9 = vpack.c.bf16 %v84_v3, %v80_v2  ;;  %v79_v10 = vld [vmem:[%s2436_s1 + $0x110] sm:$0xff] }
  0x24   :  { %1346 = vmatpush1.bf16.msra.mxu0 %v1345_v31  ;;  %v83_v11 = vld [vmem:[%s2436_s1 + $0x130] sm:$0xff]  ;;  %v1359_v12 = vpack.c.bf16 %v106_v5, %v102_v4  ;;  %v105_v13 = vld [vmem:[%s2436_s1 + $0x1e0] sm:$0xff]  ;;  %v88_v14 = vld [vmem:[%s2436_s1 + $0x158] sm:$0xff] }
  0x25   :  { %1348 = vmatprep.subr.bf16.mxu0 %v1347_v36  ;;  %v92_v15 = vld [vmem:[%s2436_s1 + $0x178] sm:$0xff]  ;;  %v326_v16 = vld [vmem:[#allocation2 + $0x8] sm:$0xff]  ;;  %v1381_v18 = vpack.c.bf16 %v83_v11, %v79_v10  ;;  %v1361_v19 = vpack.c.bf16 %v105_v13, %v101_v8  ;;  %v87_v21 = vld [vmem:[%s2436_s1 + $0x150] sm:$0xff] }
  0x26   :  { %v330_v17 = vld [vmem:[#allocation2 + $0x28] sm:$0xff]  ;;  %1378 = vmatpush1.bf16.msra.mxu1 %v1377_v6  ;;  %v1383_v20 = vpack.c.bf16 %v92_v15, %v88_v14  ;;  %v91_v22 = vld [vmem:[%s2436_s1 + $0x170] sm:$0xff]  ;;  %v96_v23 = vld [vmem:[%s2436_s1 + $0x198] sm:$0xff] }
  0x27   :  { %1380 = vmatprep.subr.bf16.mxu1 %v1379_v9  ;;  %v100_v24 = vld [vmem:[%s2436_s1 + $0x1b8] sm:$0xff]  ;;  %v1395_v25 = vpack.c.bf16 %v330_v17, %v326_v16  ;;  %v325_v26 = vld [vmem:[#allocation2] sm:$0xff]  ;;  %v1385_v28 = vpack.c.bf16 %v91_v22, %v87_v21  ;;  %v334_v29 = vld [vmem:[#allocation2 + $0x48] sm:$0xff] }
  0x28   :  { %1350 = vmatpush1.bf16.msra.mxu0 %v1349_v46  ;;  %v329_v27 = vld [vmem:[#allocation2 + $0x20] sm:$0xff]  ;;  %v338_v30 = vld [vmem:[#allocation2 + $0x68] sm:$0xff]  ;;  %v1387_v32 = vpack.c.bf16 %v100_v24, %v96_v23  ;;  %v95_v33 = vld [vmem:[%s2436_s1 + $0x190] sm:$0xff] }
  0x29   :  { %1352 = vmatprep.subr.bf16.mxu0 %v1351_v51  ;;  %v2112_v31 = vld [vmem:[%s2435_s0] sm:$0xff]  ;;  %v99_v34 = vld [vmem:[%s2436_s1 + $0x1b0] sm:$0xff]  ;;  %v104_v35 = vld [vmem:[%s2436_s1 + $0x1d8] sm:$0xff]  ;;  %v1397_v37 = vpack.c.bf16 %v329_v27, %v325_v26  ;;  %v1399_v38 = vpack.c.bf16 %v338_v30, %v334_v29 }
  0x2a   :  { %1382 = vmatpush1.bf16.msra.mxu1 %v1381_v18  ;;  %v108_v36 = vld [vmem:[%s2436_s1 + $0x1f8] sm:$0xff]  ;;  %v333_v39 = vld [vmem:[#allocation2 + $0x40] sm:$0xff]  ;;  %v1389_v41 = vpack.c.bf16 %v99_v34, %v95_v33  ;;  %v342_v42 = vld [vmem:[#allocation2 + $0x88] sm:$0xff] }
  0x2b   :  { %1384 = vmatprep.subr.bf16.mxu1 %v1383_v20  ;;  %v337_v40 = vld [vmem:[#allocation2 + $0x60] sm:$0xff]  ;;  %v346_v43 = vld [vmem:[#allocation2 + $0xa8] sm:$0xff]  ;;  %v1391_v45 = vpack.c.bf16 %v108_v36, %v104_v35  ;;  %v103_v46 = vld [vmem:[%s2436_s1 + $0x1d0] sm:$0xff] }
  0x2c   :  { %1354 = vmatpush1.bf16.msra.mxu0 %v1353_v58  ;;  %v2131_v44 = vld [vmem:[%s2435_s0 + $0x8] sm:$0xff]  ;;  %v107_v47 = vld [vmem:[%s2436_s1 + $0x1f0] sm:$0xff]  ;;  %v328_v48 = vld [vmem:[#allocation2 + $0x18] sm:$0xff]  ;;  %v1401_v50 = vpack.c.bf16 %v337_v40, %v333_v39  ;;  %v1403_v51 = vpack.c.bf16 %v346_v43, %v342_v42 }
  0x2d   :  { %1356 = vmatprep.subr.bf16.mxu0 %v1355_v63  ;;  %v332_v49 = vld [vmem:[#allocation2 + $0x38] sm:$0xff]  ;;  %v341_v52 = vld [vmem:[#allocation2 + $0x80] sm:$0xff]  ;;  %v1393_v54 = vpack.c.bf16 %v107_v47, %v103_v46  ;;  %v350_v55 = vld [vmem:[#allocation2 + $0xc8] sm:$0xff] }
  0x2e   :  { %1386 = vmatpush1.bf16.msra.mxu1 %v1385_v28  ;;  %v345_v53 = vld [vmem:[#allocation2 + $0xa0] sm:$0xff]  ;;  %v354_v56 = vld [vmem:[#allocation2 + $0xe8] sm:$0xff]  ;;  %v2144_v57 = vld [vmem:[%s2435_s0 + $0x10] sm:$0xff]  ;;  %v1523_v58 = vpack.c.bf16 %v332_v49, %v328_v48 }
  0x2f   :  { %1388 = vmatprep.subr.bf16.mxu1 %v1387_v32  ;;  %v327_v59 = vld [vmem:[#allocation2 + $0x10] sm:$0xff]  ;;  %v336_v61 = vld [vmem:[#allocation2 + $0x58] sm:$0xff]  ;;  %v1405_v62 = vpack.c.bf16 %v345_v53, %v341_v52  ;;  %v1407_v1 = vpack.c.bf16 %v354_v56, %v350_v55  ;;  %v349_v2 = vld [vmem:[#allocation2 + $0xc0] sm:$0xff] }
  0x30   :  { %1358 = vmatpush1.bf16.msra.mxu0 %v1357_v7  ;;  %v331_v60 = vld [vmem:[#allocation2 + $0x30] sm:$0xff]  ;;  %v340_v63 = vld [vmem:[#allocation2 + $0x78] sm:$0xff]  ;;  %v353_v3 = vld [vmem:[#allocation2 + $0xe0] sm:$0xff] }
  0x31   :  { %1360 = vmatprep.subr.bf16.mxu0 %v1359_v12  ;;  %v358_v4 = vld [vmem:[#allocation2 + $0x108] sm:$0xff]  ;;  %v2151_v6 = vld [vmem:[%s2435_s0 + $0x18] sm:$0xff]  ;;  %v1525_v7 = vpack.c.bf16 %v331_v60, %v327_v59  ;;  %v1527_v8 = vpack.c.bf16 %v340_v63, %v336_v61  ;;  %v335_v9 = vld [vmem:[#allocation2 + $0x50] sm:$0xff]  ;;  %v1409_v12 = vpack.c.bf16 %v353_v3, %v349_v2 }
  0x32   :  { %1390 = vmatpush1.bf16.msra.mxu1 %v1389_v41  ;;  %v362_v5 = vld [vmem:[#allocation2 + $0x128] sm:$0xff]  ;;  %v339_v10 = vld [vmem:[#allocation2 + $0x70] sm:$0xff]  ;;  %v344_v11 = vld [vmem:[#allocation2 + $0x98] sm:$0xff] }
  0x33   :  { %1392 = vmatprep.subr.bf16.mxu1 %v1391_v45  ;;  %v348_v13 = vld [vmem:[#allocation2 + $0xb8] sm:$0xff]  ;;  %v1411_v14 = vpack.c.bf16 %v362_v5, %v358_v4  ;;  %v357_v15 = vld [vmem:[#allocation2 + $0x100] sm:$0xff]  ;;  %v366_v17 = vld [vmem:[#allocation2 + $0x148] sm:$0xff] }
  0x34   :  { %1362 = vmatpush1.bf16.msra.mxu0 %v1361_v19  ;;  %v361_v16 = vld [vmem:[#allocation2 + $0x120] sm:$0xff]  ;;  %v370_v18 = vld [vmem:[#allocation2 + $0x168] sm:$0xff]  ;;  %v1529_v19 = vpack.c.bf16 %v339_v10, %v335_v9  ;;  %v1531_v20 = vpack.c.bf16 %v348_v13, %v344_v11  ;;  %v343_v21 = vld [vmem:[#allocation2 + $0x90] sm:$0xff] }
  0x35   :  { %1396 = vmatprep.subr.bf16.mxu0 %v1395_v25  ;;  %v347_v22 = vld [vmem:[#allocation2 + $0xb0] sm:$0xff]  ;;  %v352_v23 = vld [vmem:[#allocation2 + $0xd8] sm:$0xff]  ;;  %v1413_v24 = vpack.c.bf16 %v361_v16, %v357_v15  ;;  %v1415_v26 = vpack.c.bf16 %v370_v18, %v366_v17  ;;  %v365_v27 = vld [vmem:[#allocation2 + $0x140] sm:$0xff] }
  0x36   :  { %1394 = vmatpush1.bf16.msra.mxu1 %v1393_v54  ;;  %v356_v25 = vld [vmem:[#allocation2 + $0xf8] sm:$0xff]  ;;  %v369_v28 = vld [vmem:[#allocation2 + $0x160] sm:$0xff]  ;;  %v374_v29 = vld [vmem:[#allocation2 + $0x188] sm:$0xff] }
  0x37   :  { %196 = vmatmul.mubr.f32.vlgmr.msra.gmra.mrb[0].mxu0 %v2112_v31  ;;  %1524 = vmatprep.subr.bf16.mxu1 %v1523_v58  ;;  %v378_v30 = vld [vmem:[#allocation2 + $0x1a8] sm:$0xff]  ;;  %v1535_v32 = vpack.c.bf16 %v356_v25, %v352_v23  ;;  %v351_v33 = vld [vmem:[#allocation2 + $0xd0] sm:$0xff]  ;;  %v360_v35 = vld [vmem:[#allocation2 + $0x118] sm:$0xff]  ;;  %v1417_v36 = vpack.c.bf16 %v369_v28, %v365_v27 }
  0x38   :  { %201 = vmatprep.mubr.f32.mxu0 %v1877_v0  ;;  %1398 = vmatpush1.bf16.msra.mxu0 %v1397_v37  ;;  %v355_v34 = vld [vmem:[#allocation2 + $0xf0] sm:$0xff]  ;;  %v364_v37 = vld [vmem:[#allocation2 + $0x138] sm:$0xff]  ;;  %v373_v39 = vld [vmem:[#allocation2 + $0x180] sm:$0xff] }
  0x39   :  { %1400 = vmatprep.subr.bf16.mxu0 %v1399_v38  ;;  %285 = vmatmul.mubr.f32.vlgmr.msra.gmra.mrb[0].mxu1 %v2112_v31  ;;  %v1533_v31 = vpack.c.bf16 %v347_v22, %v343_v21  ;;  %v1419_v38 = vpack.c.bf16 %v378_v30, %v374_v29  ;;  %v377_v40 = vld [vmem:[#allocation2 + $0x1a0] sm:$0xff]  ;;  %v382_v41 = vld [vmem:[#allocation2 + $0x1c8] sm:$0xff]  ;;  %v1537_v43 = vpack.c.bf16 %v355_v34, %v351_v33  ;;  %v359_v45 = vld [vmem:[#allocation2 + $0x110] sm:$0xff] }
  0x3a   :  { %290 = vmatprep.mubr.f32.mxu1 %v1877_v0  ;;  %1526 = vmatpush1.bf16.msra.mxu1 %v1525_v7  ;;  %v386_v42 = vld [vmem:[#allocation2 + $0x1e8] sm:$0xff]  ;;  %v363_v46 = vld [vmem:[#allocation2 + $0x130] sm:$0xff]  ;;  %v368_v47 = vld [vmem:[#allocation2 + $0x158] sm:$0xff]  ;;  %v1421_v48 = vpack.c.bf16 %v377_v40, %v373_v39 }
  0x3b   :  { %202 = vmatmul.mubr.f32.gmra.mrb[2].mxu0 %v2131_v44  ;;  %1528 = vmatprep.subr.bf16.mxu1 %v1527_v8  ;;  %v372_v49 = vld [vmem:[#allocation2 + $0x178] sm:$0xff]  ;;  %v385_v52 = vld [vmem:[#allocation2 + $0x1e0] sm:$0xff]  ;;  %v390_v53 = vld [vmem:[#allocation2 + $0x208] sm:$0xff]  ;;  %v1541_v54 = vpack.c.bf16 %v363_v46, %v359_v45 }
  0x3c   :  { %207 = vmatprep.mubr.f32.mxu0 %v1877_v0  ;;  %1402 = vmatpush1.bf16.msra.mxu0 %v1401_v50  ;;  %v1423_v50 = vpack.c.bf16 %v386_v42, %v382_v41  ;;  %v1543_v55 = vpack.c.bf16 %v372_v49, %v368_v47  ;;  %v367_v56 = vld [vmem:[#allocation2 + $0x150] sm:$0xff]  ;;  %v376_v58 = vld [vmem:[#allocation2 + $0x198] sm:$0xff]  ;;  %v393_v63 = vld [vmem:[#allocation2 + $0x220] sm:$0xff] }
  0x3d   :  { %1404 = vmatprep.subr.bf16.mxu0 %v1403_v51  ;;  %291 = vmatmul.mubr.f32.gmra.mrb[2].mxu1 %v2131_v44  ;;  %v1539_v44 = vpack.c.bf16 %v364_v37, %v360_v35  ;;  %v381_v51 = vld [vmem:[#allocation2 + $0x1c0] sm:$0xff]  ;;  %v380_v60 = vld [vmem:[#allocation2 + $0x1b8] sm:$0xff]  ;;  %v402_v2 = vld [vmem:[#allocation2 + $0x268] sm:$0xff] }
  0x3e   :  { %296 = vmatprep.mubr.f32.mxu1 %v1877_v0  ;;  %1530 = vmatpush1.bf16.msra.mxu1 %v1529_v19  ;;  %v1425_v59 = vpack.c.bf16 %v385_v52, %v381_v51  ;;  %v1547_v4 = vpack.c.bf16 %v380_v60, %v376_v58  ;;  %v375_v5 = vld [vmem:[#allocation2 + $0x190] sm:$0xff]  ;;  %v384_v7 = vld [vmem:[#allocation2 + $0x1d8] sm:$0xff]  ;;  %v397_v11 = vld [vmem:[#allocation2 + $0x240] sm:$0xff] }
  0x3f   :  { %208 = vmatmul.mubr.f32.gmra.mrb[4].mxu0 %v2144_v57  ;;  %1532 = vmatprep.subr.bf16.mxu1 %v1531_v20  ;;  %v388_v9 = vld [vmem:[#allocation2 + $0x1f8] sm:$0xff]  ;;  %v406_v13 = vld [vmem:[#allocation2 + $0x288] sm:$0xff]  ;;  %v383_v17 = vld [vmem:[#allocation2 + $0x1d0] sm:$0xff] }
  0x40   :  { %213 = vmatprep.mubr.f32.mxu0 %v1877_v0  ;;  %1406 = vmatpush1.bf16.msra.mxu0 %v1405_v62  ;;  %v389_v62 = vld [vmem:[#allocation2 + $0x200] sm:$0xff]  ;;  %v1551_v16 = vpack.c.bf16 %v388_v9, %v384_v7  ;;  %v387_v18 = vld [vmem:[#allocation2 + $0x1f0] sm:$0xff]  ;;  %v392_v19 = vld [vmem:[#allocation2 + $0x218] sm:$0xff] }
  0x41   :  { %1408 = vmatprep.subr.bf16.mxu0 %v1407_v1  ;;  %297 = vmatmul.mubr.f32.gmra.mrb[4].mxu1 %v2144_v57  ;;  %v371_v57 = vld [vmem:[#allocation2 + $0x170] sm:$0xff]  ;;  %v398_v1 = vld [vmem:[#allocation2 + $0x248] sm:$0xff]  ;;  %v1429_v8 = vpack.c.bf16 %v393_v63, %v389_v62  ;;  %v396_v21 = vld [vmem:[#allocation2 + $0x238] sm:$0xff]  ;;  %v1553_v27 = vpack.c.bf16 %v387_v18, %v383_v17 }
  0x42   :  { %302 = vmatprep.mubr.f32.mxu1 %v1877_v0  ;;  %1534 = vmatpush1.bf16.msra.mxu1 %v1533_v31  ;;  %v394_v0 = vld [vmem:[#allocation2 + $0x228] sm:$0xff]  ;;  %v1545_v3 = vpack.c.bf16 %v371_v57, %v367_v56  ;;  %v1431_v10 = vpack.c.bf16 %v402_v2, %v398_v1  ;;  %v405_v23 = vld [vmem:[#allocation2 + $0x280] sm:$0xff]  ;;  %v1555_v28 = vpack.c.bf16 %v396_v21, %v392_v19  ;;  %v391_v29 = vld [vmem:[#allocation2 + $0x210] sm:$0xff] }
  0x43   :  { %214 = vmatmul.mubr.f32.gmra.mrb[6].mxu0 %v2151_v6  ;;  %1536 = vmatprep.subr.bf16.mxu1 %v1535_v32  ;;  %v1427_v61 = vpack.c.bf16 %v394_v0, %v390_v53  ;;  %v414_v25 = vld [vmem:[#allocation2 + $0x2c8] sm:$0xff]  ;;  %v395_v30 = vld [vmem:[#allocation2 + $0x230] sm:$0xff]  ;;  %v400_v31 = vld [vmem:[#allocation2 + $0x258] sm:$0xff] }
  0x44   :  { %1410 = vmatpush1.bf16.msra.mxu0 %v1409_v12  ;;  %v401_v12 = vld [vmem:[#allocation2 + $0x260] sm:$0xff]  ;;  %v404_v33 = vld [vmem:[#allocation2 + $0x278] sm:$0xff]  ;;  %v422_v37 = vld [vmem:[#allocation2 + $0x308] sm:$0xff]  ;;  %v1557_v39 = vpack.c.bf16 %v395_v30, %v391_v29 }
  0x45   :  { %1412 = vmatprep.subr.bf16.mxu0 %v1411_v14  ;;  %303 = vmatmul.mubr.f32.gmra.mrb[6].mxu1 %v2151_v6  ;;  %v379_v6 = vld [vmem:[#allocation2 + $0x1b0] sm:$0xff]  ;;  %v410_v14 = vld [vmem:[#allocation2 + $0x2a8] sm:$0xff]  ;;  %v1433_v20 = vpack.c.bf16 %v401_v12, %v397_v11  ;;  %v413_v35 = vld [vmem:[#allocation2 + $0x2c0] sm:$0xff]  ;;  %v1559_v40 = vpack.c.bf16 %v404_v33, %v400_v31 }
  0x46   :  { %1538 = vmatpush1.bf16.msra.mxu1 %v1537_v43  ;;  %v1549_v15 = vpack.c.bf16 %v379_v6, %v375_v5  ;;  %v1435_v22 = vpack.c.bf16 %v410_v14, %v406_v13  ;;  %v399_v41 = vld [vmem:[#allocation2 + $0x250] sm:$0xff]  ;;  %v412_v45 = vld [vmem:[#allocation2 + $0x2b8] sm:$0xff]  ;;  %v421_v60 = vld [vmem:[#allocation2 + $0x300] sm:$0xff] }
  0x47   :  { %1540 = vmatprep.subr.bf16.mxu1 %v1539_v44  ;;  %v403_v42 = vld [vmem:[#allocation2 + $0x270] sm:$0xff]  ;;  %v408_v44 = vld [vmem:[#allocation2 + $0x298] sm:$0xff]  ;;  %v433_v9 = vld [vmem:[#allocation2 + $0x360] sm:$0xff] }
  0x48   :  { %1414 = vmatpush1.bf16.msra.mxu0 %v1413_v24  ;;  %v409_v24 = vld [vmem:[#allocation2 + $0x2a0] sm:$0xff]  ;;  %v1561_v47 = vpack.c.bf16 %v403_v42, %v399_v41  ;;  %v407_v49 = vld [vmem:[#allocation2 + $0x290] sm:$0xff]  ;;  %v416_v51 = vld [vmem:[#allocation2 + $0x2d8] sm:$0xff] }
  0x49   :  { %1416 = vmatprep.subr.bf16.mxu0 %v1415_v26  ;;  %v418_v26 = vld [vmem:[#allocation2 + $0x2e8] sm:$0xff]  ;;  %v1437_v32 = vpack.c.bf16 %v409_v24, %v405_v23  ;;  %v420_v52 = vld [vmem:[#allocation2 + $0x2f8] sm:$0xff]  ;;  %v423_v62 = vld [vmem:[#allocation2 + $0x310] sm:$0xff] }
  0x4a   :  { %1542 = vmatpush1.bf16.msra.mxu1 %v1541_v54  ;;  %v1439_v34 = vpack.c.bf16 %v418_v26, %v414_v25  ;;  %v1567_v0 = vpack.c.bf16 %v420_v52, %v416_v51  ;;  %v415_v54 = vld [vmem:[#allocation2 + $0x2d0] sm:$0xff]  ;;  %v424_v56 = vld [vmem:[#allocation2 + $0x318] sm:$0xff]  ;;  %v441_v21 = vld [vmem:[#allocation2 + $0x3a0] sm:$0xff] }
  0x4b   :  { %1544 = vmatprep.subr.bf16.mxu1 %v1543_v55  ;;  %v419_v55 = vld [vmem:[#allocation2 + $0x2f0] sm:$0xff]  ;;  %v428_v57 = vld [vmem:[#allocation2 + $0x338] sm:$0xff]  ;;  %v446_v26 = vld [vmem:[#allocation2 + $0x3c8] sm:$0xff] }
  0x4c   :  { %1418 = vmatpush1.bf16.msra.mxu0 %v1417_v36  ;;  %v417_v36 = vld [vmem:[#allocation2 + $0x2e0] sm:$0xff]  ;;  %v1569_v58 = vpack.c.bf16 %v419_v55, %v415_v54  ;;  %v427_v1 = vld [vmem:[#allocation2 + $0x330] sm:$0xff]  ;;  %v432_v5 = vld [vmem:[#allocation2 + $0x358] sm:$0xff] }
  0x4d   :  { %1420 = vmatprep.subr.bf16.mxu0 %v1419_v38  ;;  %v426_v38 = vld [vmem:[#allocation2 + $0x328] sm:$0xff]  ;;  %v1441_v43 = vpack.c.bf16 %v417_v36, %v413_v35  ;;  %v1573_v2 = vpack.c.bf16 %v427_v1, %v423_v62  ;;  %v436_v7 = vld [vmem:[#allocation2 + $0x378] sm:$0xff]  ;;  %v431_v12 = vld [vmem:[#allocation2 + $0x350] sm:$0xff] }
  0x4e   :  { %1546 = vmatpush1.bf16.msra.mxu1 %v1545_v3  ;;  %v1443_v46 = vpack.c.bf16 %v426_v38, %v422_v37  ;;  %v430_v3 = vld [vmem:[#allocation2 + $0x348] sm:$0xff]  ;;  %v435_v13 = vld [vmem:[#allocation2 + $0x370] sm:$0xff]  ;;  %v440_v17 = vld [vmem:[#allocation2 + $0x398] sm:$0xff] }
  0x4f   :  { %1548 = vmatprep.subr.bf16.mxu1 %v1547_v4  ;;  %v434_v4 = vld [vmem:[#allocation2 + $0x368] sm:$0xff]  ;;  %v1577_v14 = vpack.c.bf16 %v435_v13, %v431_v12  ;;  %v444_v19 = vld [vmem:[#allocation2 + $0x3b8] sm:$0xff]  ;;  %v439_v24 = vld [vmem:[#allocation2 + $0x390] sm:$0xff] }
  0x50   :  { %1422 = vmatpush1.bf16.msra.mxu0 %v1421_v48  ;;  %v1563_v48 = vpack.c.bf16 %v412_v45, %v408_v44  ;;  %v1447_v6 = vpack.c.bf16 %v434_v4, %v430_v3  ;;  %v443_v25 = vld [vmem:[#allocation2 + $0x3b0] sm:$0xff]  ;;  %v448_v29 = vld [vmem:[#allocation2 + $0x3d8] sm:$0xff]  ;;  %v445_v33 = vld [vmem:[#allocation2 + $0x3c0] sm:$0xff]  ;;  %v111_v45 = vlaneseq }
  0x51   :  { %1424 = vmatprep.subr.bf16.mxu0 %v1423_v50  ;;  %v411_v50 = vld [vmem:[#allocation2 + $0x2b0] sm:$0xff]  ;;  %v452_v30 = vld [vmem:[#allocation2 + $0x3f8] sm:$0xff]  ;;  %v457_v62 = vld [vmem:[#allocation2 + $0x420] sm:$0xff] }
  0x52   :  { %1550 = vmatpush1.bf16.msra.mxu1 %v1549_v15  ;;  %v1565_v53 = vpack.c.bf16 %v411_v50, %v407_v49  ;;  %v438_v15 = vld [vmem:[#allocation2 + $0x388] sm:$0xff]  ;;  %v447_v35 = vld [vmem:[#allocation2 + $0x3d0] sm:$0xff]  ;;  %v456_v41 = vld [vmem:[#allocation2 + $0x418] sm:$0xff] }
  0x53   :  { %1552 = vmatprep.subr.bf16.mxu1 %v1551_v16  ;;  %v442_v16 = vld [vmem:[#allocation2 + $0x3a8] sm:$0xff]  ;;  %v451_v37 = vld [vmem:[#allocation2 + $0x3f0] sm:$0xff] }
  0x54   :  { %1426 = vmatpush1.bf16.msra.mxu0 %v1425_v59  ;;  %v1571_v59 = vpack.c.bf16 %v428_v57, %v424_v56  ;;  %v1451_v18 = vpack.c.bf16 %v442_v16, %v438_v15  ;;  %v1585_v38 = vpack.c.bf16 %v451_v37, %v447_v35  ;;  %v459_v3 = vld [vmem:[#allocation2 + $0x430] sm:$0xff]  ;;  %v462_v4 = vld [vmem:[#allocation2 + $0x448] sm:$0xff]  ;;  %v461_v15 = vld [vmem:[#allocation2 + $0x440] sm:$0xff] }
  0x55   :  { %1428 = vmatprep.subr.bf16.mxu0 %v1427_v61  ;;  %v425_v61 = vld [vmem:[#allocation2 + $0x320] sm:$0xff] }
  0x56   :  { %1554 = vmatpush1.bf16.msra.mxu1 %v1553_v27  ;;  %v1445_v63 = vpack.c.bf16 %v425_v61, %v421_v60  ;;  %v1581_v27 = vpack.c.bf16 %v443_v25, %v439_v24  ;;  %v453_v61 = vld [vmem:[#allocation2 + $0x400] sm:$0xff]  ;;  %v470_v24 = vld [vmem:[#allocation2 + $0x488] sm:$0xff] }
  0x57   :  { %1556 = vmatprep.subr.bf16.mxu1 %v1555_v28  ;;  %v450_v28 = vld [vmem:[#allocation2 + $0x3e8] sm:$0xff]  ;;  %v1461_v13 = vpack.c.bf16 %v457_v62, %v453_v61  ;;  %v465_v16 = vld [vmem:[#allocation2 + $0x460] sm:$0xff]  ;;  %v479_v61 = vld [vmem:[#allocation2 + $0x4d0] sm:$0xff] }
  0x58   :  { %1430 = vmatpush1.bf16.msra.mxu0 %v1429_v8  ;;  %v429_v8 = vld [vmem:[#allocation2 + $0x340] sm:$0xff]  ;;  %v1455_v31 = vpack.c.bf16 %v450_v28, %v446_v26  ;;  %v474_v28 = vld [vmem:[#allocation2 + $0x4a8] sm:$0xff]  ;;  %v483_v62 = vld [vmem:[#allocation2 + $0x4f0] sm:$0xff] }
  0x59   :  { %1432 = vmatprep.subr.bf16.mxu0 %v1431_v10  ;;  %v1575_v10 = vpack.c.bf16 %v436_v7, %v432_v5  ;;  %v1449_v11 = vpack.c.bf16 %v433_v9, %v429_v8  ;;  %v466_v7 = vld [vmem:[#allocation2 + $0x468] sm:$0xff]  ;;  %v464_v8 = vld [vmem:[#allocation2 + $0x458] sm:$0xff]  ;;  %v473_v37 = vld [vmem:[#allocation2 + $0x4a0] sm:$0xff] }
  0x5a   :  { %1558 = vmatpush1.bf16.msra.mxu1 %v1557_v39  ;;  %v454_v39 = vld [vmem:[#allocation2 + $0x408] sm:$0xff]  ;;  %v468_v9 = vld [vmem:[#allocation2 + $0x478] sm:$0xff] }
  0x5b   :  { %1560 = vmatprep.subr.bf16.mxu1 %v1559_v40  ;;  %v458_v40 = vld [vmem:[#allocation2 + $0x428] sm:$0xff] }
  0x5c   :  { %1434 = vmatpush1.bf16.msra.mxu0 %v1433_v20  ;;  %v437_v20 = vld [vmem:[#allocation2 + $0x380] sm:$0xff]  ;;  %v1459_v42 = vpack.c.bf16 %v458_v40, %v454_v39  ;;  %v1467_v39 = vpack.c.bf16 %v474_v28, %v470_v24 }
  0x5d   :  { %1436 = vmatprep.subr.bf16.mxu0 %v1435_v22  ;;  %v1579_v22 = vpack.c.bf16 %v444_v19, %v440_v17  ;;  %v1453_v23 = vpack.c.bf16 %v441_v21, %v437_v20  ;;  %v1463_v20 = vpack.c.bf16 %v466_v7, %v462_v4  ;;  %v1591_v21 = vpack.c.bf16 %v468_v9, %v464_v8 }
  0x5e   :  { %1562 = vmatpush1.bf16.msra.mxu1 %v1561_v47  ;;  %v1601_v9 = vpack.c.bf16 %v483_v62, %v479_v61  ;;  %v511_v61 = vld [vmem:[#allocation2 + $0x5d0] sm:$0xff] }
  0x5f   :  { %1564 = vmatprep.subr.bf16.mxu1 %v1563_v48  ;;  %v2167_v48 = vld [vmem:[%s2437_s2] sm:$0xf]  ;;  %v515_v62 = vld [vmem:[#allocation2 + $0x5f0] sm:$0xff] }
  0x60   :  { %1438 = vmatpush1.bf16.msra.mxu0 %v1437_v32  ;;  %v1583_v32 = vpack.c.bf16 %v452_v30, %v448_v29  ;;  %v472_v29 = vld [vmem:[#allocation2 + $0x498] sm:$0xff] }
  0x61   :  { %1440 = vmatprep.subr.bf16.mxu0 %v1439_v34  ;;  %v449_v34 = vld [vmem:[#allocation2 + $0x3e0] sm:$0xff]  ;;  %v476_v30 = vld [vmem:[#allocation2 + $0x4b8] sm:$0xff] }
  0x62   :  { %1566 = vmatpush1.bf16.msra.mxu1 %v1565_v53  ;;  %v1457_v36 = vpack.c.bf16 %v449_v34, %v445_v33  ;;  %v1465_v34 = vpack.c.bf16 %v465_v16, %v461_v15  ;;  %v1595_v40 = vpack.c.bf16 %v476_v30, %v472_v29  ;;  %v487_v16 = vld [vmem:[#allocation2 + $0x510] sm:$0xff] }
  0x63   :  { %1568 = vmatprep.subr.bf16.mxu1 %v1567_v0  ;;  %v495_v29 = vld [vmem:[#allocation2 + $0x550] sm:$0xff] }
  0x64   :  { %1442 = vmatpush1.bf16.msra.mxu0 %v1441_v43  ;;  %v460_v43 = vld [vmem:[#allocation2 + $0x438] sm:$0xff]  ;;  %v499_v30 = vld [vmem:[#allocation2 + $0x570] sm:$0xff] }
  0x65   :  { %1444 = vmatprep.subr.bf16.mxu0 %v1443_v46  ;;  %v1587_v44 = vpack.c.bf16 %v460_v43, %v456_v41  ;;  %v2161_v46 = vshrl.u32 %v111_v45, 7  ;;  %v471_v41 = vld [vmem:[#allocation2 + $0x490] sm:$0xff]  ;;  %v478_v43 = vld [vmem:[#allocation2 + $0x4c8] sm:$0xff]  ;;  %v480_v45 = vld [vmem:[#allocation2 + $0x4d8] sm:$0xff] }
  0x66   :  { %1570 = vmatpush1.bf16.msra.mxu1 %v1569_v58 }
  0x67   :  { %1572 = vmatprep.subr.bf16.mxu1 %v1571_v59  ;;  %v113_v47 = vsub.s32 0, %v2161_v46  ;;  %v117_v49 = vsub.s32 1, %v2161_v46  ;;  %v125_v59 = vsub.s32 3, %v2161_v46 }
  0x68   :  { %1446 = vmatpush1.bf16.msra.mxu0 %v1445_v63 }
  0x69   :  { %1448 = vmatprep.subr.bf16.mxu0 %v1447_v6  ;;  %v114_v50 = vrot.slane %v2167_v48, %v113_v47  ;;  %v118_v51 = vrot.slane %v2167_v48, %v117_v49  ;;  %v2180_v6 = vrot.slane %v2167_v48, %v125_v59 }
  0x6a   :  { %1574 = vmatpush1.bf16.msra.mxu1 %v1573_v2  ;;  %v455_v2 = vld [vmem:[#allocation2 + $0x410] sm:$0xff] }
  0x6b   :  { %1576 = vmatprep.subr.bf16.mxu1 %v1575_v10 }
  0x6c   :  { %1450 = vmatpush1.bf16.msra.mxu0 %v1449_v11 }
  0x6d   :  { %1452 = vmatprep.subr.bf16.mxu0 %v1451_v18 }
  0x6e   :  { %1578 = vmatpush1.bf16.msra.mxu1 %v1577_v14  ;;  %v1589_v14 = vpack.c.bf16 %v459_v3, %v455_v2  ;;  %v488_v2 = vld [vmem:[#allocation2 + $0x518] sm:$0xff] }
  0x6f   :  { %1580 = vmatprep.subr.bf16.mxu1 %v1579_v22  ;;  %v463_v22 = vld [vmem:[#allocation2 + $0x450] sm:$0xff]  ;;  %v492_v3 = vld [vmem:[#allocation2 + $0x538] sm:$0xff] }
  0x70   :  { %1454 = vmatpush1.bf16.msra.mxu0 %v1453_v23  ;;  %v467_v23 = vld [vmem:[#allocation2 + $0x470] sm:$0xff]  ;;  %v1603_v15 = vpack.c.bf16 %v492_v3, %v488_v2  ;;  %v520_v2 = vld [vmem:[#allocation2 + $0x618] sm:$0xff] }
  0x71   :  { %1456 = vmatprep.subr.bf16.mxu0 %v1455_v31  ;;  %v1593_v35 = vpack.c.bf16 %v467_v23, %v463_v22  ;;  %v524_v3 = vld [vmem:[#allocation2 + $0x638] sm:$0xff] }
  0x72   :  { %1582 = vmatpush1.bf16.msra.mxu1 %v1581_v27 }
  0x73   :  { %1584 = vmatprep.subr.bf16.mxu1 %v1583_v32 }
  0x74   :  { %1458 = vmatpush1.bf16.msra.mxu0 %v1457_v36  ;;  %v469_v36 = vld [vmem:[#allocation2 + $0x480] sm:$0xff] }
  0x75   :  { %1460 = vmatprep.subr.bf16.mxu0 %v1459_v42  ;;  %v475_v42 = vld [vmem:[#allocation2 + $0x4b0] sm:$0xff] }
  0x76   :  { %1586 = vmatpush1.bf16.msra.mxu1 %v1585_v38 }
  0x77   :  { %1588 = vmatprep.subr.bf16.mxu1 %v1587_v44  ;;  %v482_v44 = vld [vmem:[#allocation2 + $0x4e8] sm:$0xff] }
 0x10a   :  { %v197_v52 = vpop.f32.mrb[0].mxu0 }
 0x10b   :  { %v198_v53 = vadd.f32 %v197_v52, %v114_v50  ;;  %v199_v0 = vpop.f32.mrb[1].mxu0 }
 0x10c   :  { %v200_v54 = vadd.f32 %v199_v0, %v118_v51  ;;  %v2182_v10 = vpop.f32.mrb[0].mxu1  ;;  %v1469_v0 = vpack.c.bf16 %v473_v37, %v469_v36  ;;  %v508_v36 = vld [vmem:[#allocation2 + $0x5b8] sm:$0xff] }
 0x10d   :  { %v288_v12 = vpop.f32.mrb[1].mxu1 }
 0x10e   :  { %1754 = vtanh.f32 %v200_v54  ;;  %v203_v55 = vpop.f32.mrb[2].mxu0  ;;  %v289_v26 = vadd.f32 %v288_v12, %v2180_v6  ;;  %v1597_v54 = vpack.c.bf16 %v475_v42, %v471_v41  ;;  %v489_v12 = vld [vmem:[#allocation2 + $0x520] sm:$0xff] }
 0x10f   :  { %1756 = vtanh.f32 %v198_v53  ;;  %v204_v56 = vadd.f32 %v203_v55, %v114_v50  ;;  %v205_v57 = vpop.f32.mrb[3].mxu0  ;;  %v477_v55 = vld [vmem:[#allocation2 + $0x4c0] sm:$0xff] }
 0x110   :  { %v206_v58 = vadd.f32 %v205_v57, %v118_v51  ;;  %v2185_v31 = vpop.f32.mrb[2].mxu1 }
 0x111   :  { %1758 = vtanh.f32 %v204_v56  ;;  %v2187_v32 = vpop.f32.mrb[3].mxu1  ;;  %v481_v56 = vld [vmem:[#allocation2 + $0x4e0] sm:$0xff] }
 0x112   :  { %1760 = vtanh.f32 %v206_v58  ;;  %v209_v60 = vpop.f32.mrb[4].mxu0  ;;  %v1471_v58 = vpack.c.bf16 %v482_v44, %v478_v43  ;;  %v1473_v8 = vpack.c.bf16 %v481_v56, %v477_v55  ;;  %v503_v43 = vld [vmem:[#allocation2 + $0x590] sm:$0xff]  ;;  %v509_v56 = vld [vmem:[#allocation2 + $0x5c0] sm:$0xff] }
 0x113   :  { %v210_v63 = vadd.f32 %v209_v60, %v114_v50  ;;  %v211_v1 = vpop.f32.mrb[5].mxu0  ;;  %v507_v44 = vld [vmem:[#allocation2 + $0x5b0] sm:$0xff] }
 0x114   :  { %v212_v5 = vadd.f32 %v211_v1, %v118_v51  ;;  %v490_v1 = vld [vmem:[#allocation2 + $0x528] sm:$0xff]  ;;  %v1613_v55 = vpack.c.bf16 %v507_v44, %v503_v43  ;;  %v544_v44 = vld [vmem:[#allocation2 + $0x6d8] sm:$0xff] }
 0x115   :  { %1762 = vtanh.f32 %v210_v63  ;;  %v486_v63 = vld [vmem:[#allocation2 + $0x508] sm:$0xff] }
 0x116   :  { %1764 = vtanh.f32 %v212_v5  ;;  %v215_v11 = vpop.f32.mrb[6].mxu0  ;;  %v546_v43 = vld [vmem:[#allocation2 + $0x6e8] sm:$0xff] }
 0x117   :  { %v216_v17 = vadd.f32 %v215_v11, %v114_v50  ;;  %v217_v18 = vpop.f32.mrb[7].mxu0  ;;  %v484_v50 = vld [vmem:[#allocation2 + $0x4f8] sm:$0xff]  ;;  %v485_v11 = vld [vmem:[#allocation2 + $0x500] sm:$0xff] }
 0x118   :  { %v1755_v19 = vpop.eup %1754  ;;  %v218_v25 = vadd.f32 %v217_v18, %v118_v51  ;;  %v2189_v51 = vpop.f32.mrb[4].mxu1  ;;  %v1599_v60 = vpack.c.bf16 %v484_v50, %v480_v45  ;;  %v494_v18 = vld [vmem:[#allocation2 + $0x548] sm:$0xff]  ;;  %v1477_v23 = vpack.c.bf16 %v489_v12, %v485_v11  ;;  %v521_v11 = vld [vmem:[#allocation2 + $0x620] sm:$0xff] }
 0x119   :  { %v1757_v27 = vpop.eup %1756  ;;  %667 = vmatprep.mubr.f32.mxu0 %v1755_v19  ;;  %845 = vmatprep.mubr.f32.mxu1 %v1755_v19  ;;  %1766 = vtanh.f32 %v216_v17  ;;  %v2191_v52 = vpop.f32.mrb[5].mxu1  ;;  %v491_v17 = vld [vmem:[#allocation2 + $0x530] sm:$0xff]  ;;  %v498_v19 = vld [vmem:[#allocation2 + $0x568] sm:$0xff] }
 0x11a   :  { %668 = vmatmul.mubr.f32.vlgmr.msra.gmra.mrb[8].mxu0 %v1757_v27  ;;  %846 = vmatmul.mubr.f32.vlgmr.msra.gmra.mrb[8].mxu1 %v1757_v27  ;;  %1768 = vtanh.f32 %v218_v25  ;;  %v2193_v4 = vpop.f32.mrb[6].mxu1  ;;  %v1605_v24 = vpack.c.bf16 %v491_v17, %v487_v16  ;;  %v493_v25 = vld [vmem:[#allocation2 + $0x540] sm:$0xff]  ;;  %v1479_v27 = vpack.c.bf16 %v498_v19, %v494_v18  ;;  %v510_v45 = vld [vmem:[#allocation2 + $0x5c8] sm:$0xff]  ;;  %v528_v18 = vld [vmem:[#allocation2 + $0x658] sm:$0xff] }
 0x11b   :  { %v1759_v33 = vpop.eup %1758  ;;  %1462 = vmatpush1.bf16.msra.mxu0 %v1461_v13  ;;  %1590 = vmatpush1.bf16.msra.mxu1 %v1589_v14  ;;  %1770 = vtanh.f32 %v289_v26  ;;  %v2195_v5 = vpop.f32.mrb[7].mxu1  ;;  %v1475_v14 = vpack.c.bf16 %v490_v1, %v486_v63  ;;  %v497_v26 = vld [vmem:[#allocation2 + $0x560] sm:$0xff]  ;;  %v514_v50 = vld [vmem:[#allocation2 + $0x5e8] sm:$0xff]  ;;  %v532_v19 = vld [vmem:[#allocation2 + $0x678] sm:$0xff] }
 0x11c   :  { %v1761_v38 = vpop.eup %1760  ;;  %1464 = vmatprep.subr.bf16.mxu0 %v1463_v20  ;;  %1592 = vmatprep.subr.bf16.mxu1 %v1591_v21  ;;  %v496_v20 = vld [vmem:[#allocation2 + $0x558] sm:$0xff]  ;;  %v1481_v37 = vpack.c.bf16 %v497_v26, %v493_v25  ;;  %v518_v63 = vld [vmem:[#allocation2 + $0x608] sm:$0xff]  ;;  %v1623_v25 = vpack.c.bf16 %v532_v19, %v528_v18  ;;  %v527_v26 = vld [vmem:[#allocation2 + $0x650] sm:$0xff] }
 0x11d   :  { %673 = vmatprep.mubr.f32.mxu0 %v1761_v38  ;;  %851 = vmatprep.mubr.f32.mxu1 %v1761_v38  ;;  %v500_v21 = vld [vmem:[#allocation2 + $0x578] sm:$0xff]  ;;  %v1609_v38 = vpack.c.bf16 %v499_v30, %v495_v29  ;;  %v522_v1 = vld [vmem:[#allocation2 + $0x628] sm:$0xff] }
 0x11e   :  { %674 = vmatmul.mubr.f32.gmra.mrb[10].mxu0 %v1759_v33  ;;  %852 = vmatmul.mubr.f32.gmra.mrb[10].mxu1 %v1759_v33  ;;  %v1607_v28 = vpack.c.bf16 %v500_v21, %v496_v20  ;;  %v502_v33 = vld [vmem:[#allocation2 + $0x588] sm:$0xff]  ;;  %v1491_v12 = vpack.c.bf16 %v522_v1, %v518_v63  ;;  %v536_v30 = vld [vmem:[#allocation2 + $0x698] sm:$0xff] }
 0x11f   :  { %v1763_v53 = vpop.eup %1762  ;;  %1466 = vmatpush1.bf16.msra.mxu0 %v1465_v34  ;;  %1594 = vmatpush1.bf16.msra.mxu1 %v1593_v35  ;;  %v506_v34 = vld [vmem:[#allocation2 + $0x5a8] sm:$0xff]  ;;  %v504_v35 = vld [vmem:[#allocation2 + $0x598] sm:$0xff] }
 0x120   :  { %v1765_v57 = vpop.eup %1764  ;;  %1468 = vmatprep.subr.bf16.mxu0 %v1467_v39  ;;  %1596 = vmatprep.subr.bf16.mxu1 %v1595_v40  ;;  %v501_v39 = vld [vmem:[#allocation2 + $0x580] sm:$0xff]  ;;  %v1483_v41 = vpack.c.bf16 %v506_v34, %v502_v33  ;;  %v1611_v42 = vpack.c.bf16 %v508_v36, %v504_v35  ;;  %v526_v16 = vld [vmem:[#allocation2 + $0x648] sm:$0xff]  ;;  %v540_v33 = vld [vmem:[#allocation2 + $0x6b8] sm:$0xff] }
 0x121   :  { %679 = vmatprep.mubr.f32.mxu0 %v1765_v57  ;;  %857 = vmatprep.mubr.f32.mxu1 %v1765_v57  ;;  %v505_v40 = vld [vmem:[#allocation2 + $0x5a0] sm:$0xff]  ;;  %v530_v17 = vld [vmem:[#allocation2 + $0x668] sm:$0xff]  ;;  %v556_v63 = vld [vmem:[#allocation2 + $0x738] sm:$0xff] }
 0x122   :  { %680 = vmatmul.mubr.f32.gmra.mrb[12].mxu0 %v1763_v53  ;;  %858 = vmatmul.mubr.f32.gmra.mrb[12].mxu1 %v1763_v53  ;;  %v512_v53 = vld [vmem:[#allocation2 + $0x5d8] sm:$0xff]  ;;  %v513_v57 = vld [vmem:[#allocation2 + $0x5e0] sm:$0xff]  ;;  %v538_v29 = vld [vmem:[#allocation2 + $0x6a8] sm:$0xff] }
 0x123   :  { %v1767_v7 = vpop.eup %1766  ;;  %1470 = vmatpush1.bf16.msra.mxu0 %v1469_v0  ;;  %1598 = vmatpush1.bf16.msra.mxu1 %v1597_v54  ;;  %v516_v0 = vld [vmem:[#allocation2 + $0x5f8] sm:$0xff]  ;;  %v1485_v54 = vpack.c.bf16 %v505_v40, %v501_v39  ;;  %v533_v36 = vld [vmem:[#allocation2 + $0x680] sm:$0xff]  ;;  %v1627_v39 = vpack.c.bf16 %v540_v33, %v536_v30  ;;  %v535_v40 = vld [vmem:[#allocation2 + $0x690] sm:$0xff]  ;;  %v295_v33 = vadd.f32 %v2187_v32, %v2180_v6 }
 0x124   :  { %v1769_v13 = vpop.eup %1768  ;;  %1472 = vmatprep.subr.bf16.mxu0 %v1471_v58  ;;  %1600 = vmatprep.subr.bf16.mxu1 %v1599_v60  ;;  %v1487_v58 = vpack.c.bf16 %v514_v50, %v510_v45  ;;  %v1615_v60 = vpack.c.bf16 %v516_v0, %v512_v53  ;;  %v548_v45 = vld [vmem:[#allocation2 + $0x6f8] sm:$0xff]  ;;  %v541_v0 = vld [vmem:[#allocation2 + $0x6c0] sm:$0xff] }
 0x125   :  { %685 = vmatprep.mubr.f32.mxu0 %v1769_v13  ;;  %863 = vmatprep.mubr.f32.mxu1 %v1769_v13  ;;  %v1771_v22 = vpop.eup %1770  ;;  %v1619_v13 = vpack.c.bf16 %v524_v3, %v520_v2  ;;  %v121_v3 = vsub.s32 2, %v2161_v46  ;;  %v572_v30 = vld [vmem:[#allocation2 + $0x7b8] sm:$0xff]  ;;  %1772 = vtanh.f32 %v295_v33 }
 0x126   :  { %686 = vmatmul.mubr.f32.gmra.mrb[14].mxu0 %v1767_v7  ;;  %864 = vmatmul.mubr.f32.gmra.mrb[14].mxu1 %v1767_v7  ;;  %v1489_v7 = vpack.c.bf16 %v513_v57, %v509_v56  ;;  %v1631_v56 = vpack.c.bf16 %v548_v45, %v544_v44  ;;  %v543_v57 = vld [vmem:[#allocation2 + $0x6d0] sm:$0xff]  ;;  %v576_v44 = vld [vmem:[#allocation2 + $0x7d8] sm:$0xff] }
 0x127   :  { %1474 = vmatpush1.bf16.msra.mxu0 %v1473_v8  ;;  %1602 = vmatpush1.bf16.msra.mxu1 %v1601_v9  ;;  %v1617_v8 = vpack.c.bf16 %v515_v62, %v511_v61  ;;  %v517_v9 = vld [vmem:[#allocation2 + $0x600] sm:$0xff]  ;;  %v554_v61 = vld [vmem:[#allocation2 + $0x728] sm:$0xff]  ;;  %v552_v62 = vld [vmem:[#allocation2 + $0x718] sm:$0xff]  ;;  %v2201_v18 = vrot.slane %v2167_v48, %v121_v3 }
 0x128   :  { %1476 = vmatprep.subr.bf16.mxu0 %v1475_v14  ;;  %1604 = vmatprep.subr.bf16.mxu1 %v1603_v15  ;;  %v519_v14 = vld [vmem:[#allocation2 + $0x610] sm:$0xff]  ;;  %v1493_v20 = vpack.c.bf16 %v521_v11, %v517_v9  ;;  %v1635_v11 = vpack.c.bf16 %v556_v63, %v552_v62  ;;  %v580_v45 = vld [vmem:[#allocation2 + $0x7f8] sm:$0xff]  ;;  %v307_v62 = vadd.f32 %v2195_v5, %v2180_v6  ;;  %v1008_v5 = vld [vmem:[%s2440_s5 + $0x108] sm:$0xff] }
 0x129   :  { %756 = vmatprep.mubr.f32.mxu0 %v1771_v22  ;;  %934 = vmatprep.mubr.f32.mxu1 %v1771_v22  ;;  %v523_v15 = vld [vmem:[#allocation2 + $0x630] sm:$0xff]  ;;  %v525_v22 = vld [vmem:[#allocation2 + $0x640] sm:$0xff]  ;;  %v287_v48 = vadd.f32 %v2182_v10, %v2201_v18  ;;  %v301_v10 = vadd.f32 %v2191_v52, %v2180_v6  ;;  %v293_v32 = vadd.f32 %v2185_v31, %v2201_v18  ;;  %v992_v31 = vld [vmem:[%s2440_s5 + $0x88] sm:$0xff] }
 0x12a   :  { %v1621_v21 = vpack.c.bf16 %v523_v15, %v519_v14  ;;  %v558_v14 = vld [vmem:[#allocation2 + $0x748] sm:$0xff]  ;;  %v991_v52 = vld [vmem:[%s2440_s5 + $0x80] sm:$0xff]  ;;  %v299_v63 = vadd.f32 %v2189_v51, %v2201_v18 }
 0x12b   :  { %1478 = vmatpush1.bf16.msra.mxu0 %v1477_v23  ;;  %1606 = vmatpush1.bf16.msra.mxu1 %v1605_v24  ;;  %v529_v23 = vld [vmem:[#allocation2 + $0x660] sm:$0xff]  ;;  %v1495_v24 = vpack.c.bf16 %v530_v17, %v526_v16  ;;  %v562_v15 = vld [vmem:[#allocation2 + $0x768] sm:$0xff]  ;;  %v560_v16 = vld [vmem:[#allocation2 + $0x758] sm:$0xff]  ;;  %1774 = vtanh.f32 %v287_v48 }
 0x12c   :  { %1480 = vmatprep.subr.bf16.mxu0 %v1479_v27  ;;  %1608 = vmatprep.subr.bf16.mxu1 %v1607_v28  ;;  %v531_v27 = vld [vmem:[#allocation2 + $0x670] sm:$0xff]  ;;  %v534_v28 = vld [vmem:[#allocation2 + $0x688] sm:$0xff]  ;;  %v1497_v34 = vpack.c.bf16 %v529_v23, %v525_v22  ;;  %v564_v17 = vld [vmem:[#allocation2 + $0x778] sm:$0xff]  ;;  %v1511_v23 = vpack.c.bf16 %v562_v15, %v558_v14  ;;  %1776 = vtanh.f32 %v301_v10  ;;  %v305_v15 = vadd.f32 %v2193_v4, %v2201_v18 }
 0x12d   :  { %v1625_v35 = vpack.c.bf16 %v531_v27, %v527_v26  ;;  %v561_v22 = vld [vmem:[#allocation2 + $0x760] sm:$0xff]  ;;  %v563_v26 = vld [vmem:[#allocation2 + $0x770] sm:$0xff]  ;;  %v566_v27 = vld [vmem:[#allocation2 + $0x788] sm:$0xff]  ;;  %1778 = vtanh.f32 %v293_v32 }
 0x12e   :  { %v976_v6 = vld [vmem:[%s2440_s5 + $0x8] sm:$0xff]  ;;  %v1007_v51 = vld [vmem:[%s2440_s5 + $0x100] sm:$0xff]  ;;  %1780 = vtanh.f32 %v307_v62  ;;  %v1026_v14 = vld [vmem:[%s2440_s5 + $0x198] sm:$0xff] }
 0x12f   :  { %1482 = vmatpush1.bf16.msra.mxu0 %v1481_v37  ;;  %1610 = vmatpush1.bf16.msra.mxu1 %v1609_v38  ;;  %v537_v37 = vld [vmem:[#allocation2 + $0x6a0] sm:$0xff]  ;;  %v1499_v38 = vpack.c.bf16 %v538_v29, %v534_v28  ;;  %v570_v28 = vld [vmem:[#allocation2 + $0x7a8] sm:$0xff]  ;;  %v568_v29 = vld [vmem:[#allocation2 + $0x798] sm:$0xff]  ;;  %1782 = vtanh.f32 %v299_v63 }
 0x130   :  { %1484 = vmatprep.subr.bf16.mxu0 %v1483_v41  ;;  %1612 = vmatprep.subr.bf16.mxu1 %v1611_v42  ;;  %v539_v41 = vld [vmem:[#allocation2 + $0x6b0] sm:$0xff]  ;;  %v542_v42 = vld [vmem:[#allocation2 + $0x6c8] sm:$0xff]  ;;  %v1501_v50 = vpack.c.bf16 %v537_v37, %v533_v36  ;;  %v565_v36 = vld [vmem:[#allocation2 + $0x780] sm:$0xff]  ;;  %1784 = vtanh.f32 %v305_v15 }
 0x131   :  { %v1629_v53 = vpack.c.bf16 %v539_v41, %v535_v40  ;;  %v569_v37 = vld [vmem:[#allocation2 + $0x7a0] sm:$0xff]  ;;  %v567_v40 = vld [vmem:[#allocation2 + $0x790] sm:$0xff]  ;;  %v1010_v18 = vld [vmem:[%s2440_s5 + $0x118] sm:$0xff] }
 0x132   :  { %v571_v41 = vld [vmem:[#allocation2 + $0x7b0] sm:$0xff]  ;;  %v979_v48 = vld [vmem:[%s2440_s5 + $0x20] sm:$0xff]  ;;  %v1032_v63 = vld [vmem:[%s2440_s5 + $0x1c8] sm:$0xff] }
 0x133   :  { %1486 = vmatpush1.bf16.msra.mxu0 %v1485_v54  ;;  %1614 = vmatpush1.bf16.msra.mxu1 %v1613_v55  ;;  %v545_v54 = vld [vmem:[#allocation2 + $0x6e0] sm:$0xff]  ;;  %v1503_v55 = vpack.c.bf16 %v546_v43, %v542_v42  ;;  %v574_v42 = vld [vmem:[#allocation2 + $0x7c8] sm:$0xff]  ;;  %v1009_v4 = vld [vmem:[%s2440_s5 + $0x110] sm:$0xff] }
 0x134   :  { %1488 = vmatprep.subr.bf16.mxu0 %v1487_v58  ;;  %1616 = vmatprep.subr.bf16.mxu1 %v1615_v60  ;;  %v547_v58 = vld [vmem:[#allocation2 + $0x6f0] sm:$0xff]  ;;  %v550_v60 = vld [vmem:[#allocation2 + $0x708] sm:$0xff]  ;;  %v1505_v1 = vpack.c.bf16 %v545_v54, %v541_v0  ;;  %v573_v0 = vld [vmem:[#allocation2 + $0x7c0] sm:$0xff]  ;;  %v1689_v33 = vpack.c.bf16 %v1010_v18, %v1009_v4 }
 0x135   :  { %v1633_v2 = vpack.c.bf16 %v547_v58, %v543_v57  ;;  %v1507_v9 = vpack.c.bf16 %v554_v61, %v550_v60  ;;  %v578_v43 = vld [vmem:[#allocation2 + $0x7e8] sm:$0xff]  ;;  %v577_v54 = vld [vmem:[#allocation2 + $0x7e0] sm:$0xff]  ;;  %v575_v57 = vld [vmem:[#allocation2 + $0x7d0] sm:$0xff] }
 0x136   :  { %v579_v58 = vld [vmem:[#allocation2 + $0x7f0] sm:$0xff]  ;;  %v1023_v60 = vld [vmem:[%s2440_s5 + $0x180] sm:$0xff]  ;;  %v1024_v61 = vld [vmem:[%s2440_s5 + $0x188] sm:$0xff] }
 0x137   :  { %1490 = vmatpush1.bf16.msra.mxu0 %v1489_v7  ;;  %1618 = vmatpush1.bf16.msra.mxu1 %v1617_v8  ;;  %v549_v7 = vld [vmem:[#allocation2 + $0x700] sm:$0xff]  ;;  %v981_v32 = vld [vmem:[%s2440_s5 + $0x30] sm:$0xff] }
 0x138   :  { %1492 = vmatprep.subr.bf16.mxu0 %v1491_v12  ;;  %1620 = vmatprep.subr.bf16.mxu1 %v1619_v13  ;;  %v553_v8 = vld [vmem:[#allocation2 + $0x720] sm:$0xff]  ;;  %v551_v12 = vld [vmem:[#allocation2 + $0x710] sm:$0xff] }
 0x139   :  { %v555_v13 = vld [vmem:[#allocation2 + $0x730] sm:$0xff]  ;;  %v1509_v19 = vpack.c.bf16 %v553_v8, %v549_v7  ;;  %v1651_v7 = vpack.c.bf16 %v992_v31, %v991_v52  ;;  %v1683_v8 = vpack.c.bf16 %v1024_v61, %v1023_v60  ;;  %v999_v31 = vld [vmem:[%s2440_s5 + $0xc0] sm:$0xff]  ;;  %v1000_v60 = vld [vmem:[%s2440_s5 + $0xc8] sm:$0xff] }
 0x13a   :  { %v1031_v61 = vld [vmem:[%s2440_s5 + $0x1c0] sm:$0xff]  ;;  %v1667_v62 = vpack.c.bf16 %v1000_v60, %v999_v31  ;;  %v985_v15 = vld [vmem:[%s2440_s5 + $0x50] sm:$0xff] }
 0x13b   :  { %1494 = vmatpush1.bf16.msra.mxu0 %v1493_v20  ;;  %1622 = vmatpush1.bf16.msra.mxu1 %v1621_v21  ;;  %v1637_v20 = vpack.c.bf16 %v555_v13, %v551_v12  ;;  %v557_v21 = vld [vmem:[#allocation2 + $0x740] sm:$0xff]  ;;  %v994_v12 = vld [vmem:[%s2440_s5 + $0x98] sm:$0xff]  ;;  %v1025_v13 = vld [vmem:[%s2440_s5 + $0x190] sm:$0xff] }
 0x13c   :  { %1496 = vmatprep.subr.bf16.mxu0 %v1495_v24  ;;  %1624 = vmatprep.subr.bf16.mxu1 %v1623_v25  ;;  %v1639_v24 = vpack.c.bf16 %v564_v17, %v560_v16  ;;  %v559_v25 = vld [vmem:[#allocation2 + $0x750] sm:$0xff]  ;;  %v1773_v16 = vpop.eup %1772  ;;  %v1035_v4 = vld [vmem:[%s2440_s5 + $0x1e0] sm:$0xff] }
 0x13f   :  { %1498 = vmatpush1.bf16.msra.mxu0 %v1497_v34  ;;  %1626 = vmatpush1.bf16.msra.mxu1 %v1625_v35  ;;  %v1513_v34 = vpack.c.bf16 %v561_v22, %v557_v21  ;;  %v1641_v35 = vpack.c.bf16 %v563_v26, %v559_v25  ;;  %v978_v21 = vld [vmem:[%s2440_s5 + $0x18] sm:$0xff]  ;;  %v1775_v22 = vpop.eup %1774  ;;  %v995_v25 = vld [vmem:[%s2440_s5 + $0xa0] sm:$0xff]  ;;  %v996_v26 = vld [vmem:[%s2440_s5 + $0xa8] sm:$0xff] }
 0x140   :  { %1500 = vmatprep.subr.bf16.mxu0 %v1499_v38  ;;  %1628 = vmatprep.subr.bf16.mxu1 %v1627_v39  ;;  %v1515_v38 = vpack.c.bf16 %v570_v28, %v566_v27  ;;  %v1643_v39 = vpack.c.bf16 %v572_v30, %v568_v29  ;;  %v1027_v27 = vld [vmem:[%s2440_s5 + $0x1a0] sm:$0xff]  ;;  %v1028_v28 = vld [vmem:[%s2440_s5 + $0x1a8] sm:$0xff]  ;;  %v1777_v29 = vpop.eup %1776 }
 0x143   :  { %1502 = vmatpush1.bf16.msra.mxu0 %v1501_v50  ;;  %1630 = vmatpush1.bf16.msra.mxu1 %v1629_v53  ;;  %v1517_v50 = vpack.c.bf16 %v569_v37, %v565_v36  ;;  %v1645_v53 = vpack.c.bf16 %v571_v41, %v567_v40  ;;  %v1659_v36 = vpack.c.bf16 %v996_v26, %v995_v25  ;;  %v997_v40 = vld [vmem:[%s2440_s5 + $0xb0] sm:$0xff]  ;;  %v998_v41 = vld [vmem:[%s2440_s5 + $0xb8] sm:$0xff]  ;;  %v1036_v25 = vld [vmem:[%s2440_s5 + $0x1e8] sm:$0xff] }
 0x144   :  { %1504 = vmatprep.subr.bf16.mxu0 %v1503_v55  ;;  %1632 = vmatprep.subr.bf16.mxu1 %v1631_v56  ;;  %v1519_v55 = vpack.c.bf16 %v578_v43, %v574_v42  ;;  %v1647_v56 = vpack.c.bf16 %v580_v45, %v576_v44  ;;  %v1691_v37 = vpack.c.bf16 %v1028_v28, %v1027_v27  ;;  %v1029_v42 = vld [vmem:[%s2440_s5 + $0x1b0] sm:$0xff]  ;;  %v1030_v43 = vld [vmem:[%s2440_s5 + $0x1b8] sm:$0xff]  ;;  %v987_v26 = vld [vmem:[%s2440_s5 + $0x60] sm:$0xff] }
 0x145   :  { %v988_v27 = vld [vmem:[%s2440_s5 + $0x68] sm:$0xff]  ;;  %v1707_v28 = vpack.c.bf16 %v1036_v25, %v1035_v4 }
 0x147   :  { %1506 = vmatpush1.bf16.msra.mxu0 %v1505_v1  ;;  %1634 = vmatpush1.bf16.msra.mxu1 %v1633_v2  ;;  %v1521_v1 = vpack.c.bf16 %v577_v54, %v573_v0  ;;  %v1649_v2 = vpack.c.bf16 %v579_v58, %v575_v57  ;;  %v1695_v0 = vpack.c.bf16 %v1030_v43, %v1029_v42  ;;  %v982_v54 = vld [vmem:[%s2440_s5 + $0x38] sm:$0xff]  ;;  %v1021_v43 = vld [vmem:[%s2440_s5 + $0x170] sm:$0xff] }
 0x148   :  { %1508 = vmatprep.subr.bf16.mxu0 %v1507_v9  ;;  %1636 = vmatprep.subr.bf16.mxu1 %v1635_v11  ;;  %v975_v9 = vld [vmem:[%s2440_s5] sm:$0xff]  ;;  %v993_v11 = vld [vmem:[%s2440_s5 + $0x90] sm:$0xff]  ;;  %v1665_v57 = vpack.c.bf16 %v982_v54, %v981_v32 }
 0x149   :  { %v1653_v17 = vpack.c.bf16 %v976_v6, %v975_v9  ;;  %v1016_v6 = vld [vmem:[%s2440_s5 + $0x148] sm:$0xff] }
 0x14b   :  { %1510 = vmatpush1.bf16.msra.mxu0 %v1509_v19  ;;  %1638 = vmatpush1.bf16.msra.mxu1 %v1637_v20  ;;  %v1685_v19 = vpack.c.bf16 %v1008_v5, %v1007_v51  ;;  %v977_v20 = vld [vmem:[%s2440_s5 + $0x10] sm:$0xff] }
 0x14c   :  { %1512 = vmatprep.subr.bf16.mxu0 %v1511_v23  ;;  %1640 = vmatprep.subr.bf16.mxu1 %v1639_v24  ;;  %v1655_v23 = vpack.c.bf16 %v994_v12, %v993_v11  ;;  %v1687_v24 = vpack.c.bf16 %v1026_v14, %v1025_v13  ;;  %v1657_v30 = vpack.c.bf16 %v978_v21, %v977_v20  ;;  %v1001_v5 = vld [vmem:[%s2440_s5 + $0xd0] sm:$0xff]  ;;  %v1002_v11 = vld [vmem:[%s2440_s5 + $0xd8] sm:$0xff] }
 0x14d   :  { %v1033_v12 = vld [vmem:[%s2440_s5 + $0x1d0] sm:$0xff]  ;;  %v1671_v13 = vpack.c.bf16 %v1002_v11, %v1001_v5  ;;  %v1034_v14 = vld [vmem:[%s2440_s5 + $0x1d8] sm:$0xff] }
 0x14e   :  { %v1017_v20 = vld [vmem:[%s2440_s5 + $0x150] sm:$0xff]  ;;  %v1018_v21 = vld [vmem:[%s2440_s5 + $0x158] sm:$0xff] }
 0x14f   :  { %1514 = vmatpush1.bf16.msra.mxu0 %v1513_v34  ;;  %1642 = vmatpush1.bf16.msra.mxu1 %v1641_v35  ;;  %v980_v34 = vld [vmem:[%s2440_s5 + $0x28] sm:$0xff]  ;;  %v1779_v35 = vpop.eup %1778 }
 0x150   :  { %1516 = vmatprep.subr.bf16.mxu0 %v1515_v38  ;;  %1644 = vmatprep.subr.bf16.mxu1 %v1643_v39  ;;  %v1011_v38 = vld [vmem:[%s2440_s5 + $0x120] sm:$0xff]  ;;  %v1012_v39 = vld [vmem:[%s2440_s5 + $0x128] sm:$0xff]  ;;  %v1781_v44 = vpop.eup %1780  ;;  %v1661_v45 = vpack.c.bf16 %v980_v34, %v979_v48  ;;  %v1005_v34 = vld [vmem:[%s2440_s5 + $0xf0] sm:$0xff] }
 0x151   :  { %v1693_v10 = vpack.c.bf16 %v1012_v39, %v1011_v38  ;;  %v1038_v38 = vld [vmem:[%s2440_s5 + $0x1f8] sm:$0xff]  ;;  %v989_v39 = vld [vmem:[%s2440_s5 + $0x70] sm:$0xff] }
 0x153   :  { %1518 = vmatpush1.bf16.msra.mxu0 %v1517_v50  ;;  %1646 = vmatpush1.bf16.msra.mxu1 %v1645_v53  ;;  %v1783_v50 = vpop.eup %1782  ;;  %v1663_v53 = vpack.c.bf16 %v998_v41, %v997_v40  ;;  %v990_v40 = vld [vmem:[%s2440_s5 + $0x78] sm:$0xff] }
 0x154   :  { %1520 = vmatprep.subr.bf16.mxu0 %v1519_v55  ;;  %1648 = vmatprep.subr.bf16.mxu1 %v1647_v56  ;;  %v1013_v55 = vld [vmem:[%s2440_s5 + $0x130] sm:$0xff]  ;;  %v1014_v56 = vld [vmem:[%s2440_s5 + $0x138] sm:$0xff]  ;;  %v1785_v52 = vpop.eup %1784  ;;  %v1681_v42 = vpack.c.bf16 %v990_v40, %v989_v39 }
 0x155   :  { %v1697_v58 = vpack.c.bf16 %v1014_v56, %v1013_v55 }
 0x157   :  { %1522 = vmatpush1.bf16.msra.mxu0 %v1521_v1  ;;  %1650 = vmatpush1.bf16.msra.mxu1 %v1649_v2  ;;  %v1699_v1 = vpack.c.bf16 %v1032_v63, %v1031_v61  ;;  %v983_v2 = vld [vmem:[%s2440_s5 + $0x40] sm:$0xff] }
 0x158   :  { %1652 = vmatprep.subr.bf16.mxu0 %v1651_v7  ;;  %1684 = vmatprep.subr.bf16.mxu1 %v1683_v8  ;;  %v984_v7 = vld [vmem:[%s2440_s5 + $0x48] sm:$0xff]  ;;  %v1015_v8 = vld [vmem:[%s2440_s5 + $0x140] sm:$0xff] }
 0x159   :  { %v1669_v9 = vpack.c.bf16 %v984_v7, %v983_v2  ;;  %v1701_v51 = vpack.c.bf16 %v1016_v6, %v1015_v8 }
 0x15a   :  { %757 = vmatmul.mubr.f32.vlgmr.msra.gmra.mrb[8].mxu0 %v1775_v22  ;;  %935 = vmatmul.mubr.f32.vlgmr.msra.gmra.mrb[8].mxu1 %v1775_v22  ;;  %v1705_v22 = vpack.c.bf16 %v1018_v21, %v1017_v20 }
 0x15b   :  { %762 = vmatprep.mubr.f32.mxu0 %v1773_v16  ;;  %940 = vmatprep.mubr.f32.mxu1 %v1773_v16  ;;  %v986_v16 = vld [vmem:[%s2440_s5 + $0x58] sm:$0xff] }
 0x15c   :  { %1654 = vmatpush3.bf16.msra.mxu0 %v1653_v17  ;;  %1686 = vmatpush3.bf16.msra.mxu1 %v1685_v19  ;;  %v1703_v17 = vpack.c.bf16 %v1034_v14, %v1033_v12  ;;  %v1673_v19 = vpack.c.bf16 %v986_v16, %v985_v15 }
 0x15d   :  { %1656 = vmatprep.subr.bf16.mxu0 %v1655_v23  ;;  %1688 = vmatprep.subr.bf16.mxu1 %v1687_v24  ;;  %v1003_v23 = vld [vmem:[%s2440_s5 + $0xe0] sm:$0xff]  ;;  %v1004_v24 = vld [vmem:[%s2440_s5 + $0xe8] sm:$0xff] }
 0x15e   :  { %763 = vmatmul.mubr.f32.gmra.mrb[10].mxu0 %v1779_v35  ;;  %941 = vmatmul.mubr.f32.gmra.mrb[10].mxu1 %v1779_v35  ;;  %v1675_v18 = vpack.c.bf16 %v1004_v24, %v1003_v23  ;;  %v1006_v35 = vld [vmem:[%s2440_s5 + $0xf8] sm:$0xff] }
 0x15f   :  { %768 = vmatprep.mubr.f32.mxu0 %v1777_v29  ;;  %946 = vmatprep.mubr.f32.mxu1 %v1777_v29  ;;  %v1677_v29 = vpack.c.bf16 %v988_v27, %v987_v26 }
 0x160   :  { %1658 = vmatpush3.bf16.msra.mxu0 %v1657_v30  ;;  %1690 = vmatpush3.bf16.msra.mxu1 %v1689_v33  ;;  %v1019_v30 = vld [vmem:[%s2440_s5 + $0x160] sm:$0xff]  ;;  %v1020_v33 = vld [vmem:[%s2440_s5 + $0x168] sm:$0xff] }
 0x161   :  { %1660 = vmatprep.subr.bf16.mxu0 %v1659_v36  ;;  %1692 = vmatprep.subr.bf16.mxu1 %v1691_v37  ;;  %v1709_v48 = vpack.c.bf16 %v1020_v33, %v1019_v30  ;;  %v1037_v36 = vld [vmem:[%s2440_s5 + $0x1f0] sm:$0xff]  ;;  %v1679_v37 = vpack.c.bf16 %v1006_v35, %v1005_v34 }
 0x162   :  { %769 = vmatmul.mubr.f32.gmra.mrb[12].mxu0 %v1783_v50  ;;  %947 = vmatmul.mubr.f32.gmra.mrb[12].mxu1 %v1783_v50  ;;  %v1711_v41 = vpack.c.bf16 %v1038_v38, %v1037_v36 }
 0x163   :  { %774 = vmatprep.mubr.f32.mxu0 %v1781_v44  ;;  %952 = vmatprep.mubr.f32.mxu1 %v1781_v44  ;;  %v1022_v44 = vld [vmem:[%s2440_s5 + $0x178] sm:$0xff] }
 0x164   :  { %1662 = vmatpush3.bf16.msra.mxu0 %v1661_v45  ;;  %1694 = vmatpush3.bf16.msra.mxu1 %v1693_v10  ;;  %v1713_v45 = vpack.c.bf16 %v1022_v44, %v1021_v43  ;;  %v581_v10 = vld [vmem:[%s2439_s4] sm:$0xf] }
 0x165   :  { %1664 = vmatprep.subr.bf16.mxu0 %v1663_v53  ;;  %1696 = vmatprep.subr.bf16.mxu1 %v1695_v0  ;;  %v586_v32 = vrot.slane %v581_v10, %v113_v47  ;;  %v590_v50 = vrot.slane %v581_v10, %v117_v49  ;;  %v598_v53 = vrot.slane %v581_v10, %v125_v59 }
 0x166   :  { %775 = vmatmul.mubr.f32.gmra.mrb[14].mxu0 %v1785_v52  ;;  %953 = vmatmul.mubr.f32.gmra.mrb[14].mxu1 %v1785_v52  ;;  %v594_v0 = vrot.slane %v581_v10, %v121_v3 }
 0x168   :  { %1666 = vmatpush3.bf16.msra.mxu0 %v1665_v57  ;;  %1698 = vmatpush3.bf16.msra.mxu1 %v1697_v58 }
 0x169   :  { %1668 = vmatprep.subr.bf16.mxu0 %v1667_v62  ;;  %1700 = vmatprep.subr.bf16.mxu1 %v1699_v1 }
 0x16c   :  { %1670 = vmatpush3.bf16.msra.mxu0 %v1669_v9  ;;  %1702 = vmatpush3.bf16.msra.mxu1 %v1701_v51 }
 0x16d   :  { %1672 = vmatprep.subr.bf16.mxu0 %v1671_v13  ;;  %1704 = vmatprep.subr.bf16.mxu1 %v1703_v17 }
 0x170   :  { %1674 = vmatpush3.bf16.msra.mxu0 %v1673_v19  ;;  %1706 = vmatpush3.bf16.msra.mxu1 %v1705_v22 }
 0x171   :  { %1676 = vmatprep.subr.bf16.mxu0 %v1675_v18  ;;  %1708 = vmatprep.subr.bf16.mxu1 %v1707_v28 }
 0x174   :  { %1678 = vmatpush3.bf16.msra.mxu0 %v1677_v29  ;;  %1710 = vmatpush3.bf16.msra.mxu1 %v1709_v48 }
 0x175   :  { %1680 = vmatprep.subr.bf16.mxu0 %v1679_v37  ;;  %1712 = vmatprep.subr.bf16.mxu1 %v1711_v41  ;;  %v1242_v37 = vld [vmem:[%s2441_s6] ss:$0 sm:$0xff]  ;;  %s1878_s6 = smov [#allocation5]  }
 0x176   :  { %s1230_s27 = sshll.u32 %s1878_s6, 4  ;;  %s1231_s27 = int_to_ptr.vmem [resolvable:$true] %s1230_s27 }
 0x177   :  { %s1848_s1 = scalar_lea.vmem %s1231_s27, 512  ;;  %p1853_p9 = scmp.lt.s32.totalorder %s1231_s27, %s1231_s27 }
 0x178   :  { %1682 = vmatpush3.bf16.msra.mxu0 %v1681_v42  ;;  %1714 = vmatpush3.bf16.msra.mxu1 %v1713_v45  ;;  %p1849_p8 = scmp.ne.s32.totalorder %s1231_s27, %s1848_s1  ;;  %p1854_p10 = scmp.lt.s32.totalorder %s1848_s1, %s1848_s1 }
 0x17a   :  { %p1855_p11 = por %p1854_p10, %p1853_p9 }
 0x17c   :  { %p1856_p12 = pnand %p1855_p11, %p1849_p8 }
 0x22d   :  { %v758_v54 = vpop.f32.mrb[8].mxu0  ;;  %v936_v55 = vpop.f32.mrb[8].mxu1 }
 0x22e   :  { %v1715_v56 = vadd.f32 %v758_v54, %v586_v32  ;;  %v760_v57 = vpop.f32.mrb[9].mxu0  ;;  %v938_v58 = vpop.f32.mrb[9].mxu1  ;;  %v1723_v60 = vadd.f32 %v936_v55, %v594_v0 }
 0x22f   :  { %v1716_v52 = vadd.f32 %v760_v57, %v590_v50  ;;  %v1724_v31 = vadd.f32 %v938_v58, %v598_v53 }
 0x230   :  { %1786 = vtanh.f32 %v1715_v56 }
 0x231   :  { %v764_v61 = vpop.f32.mrb[10].mxu0  ;;  %v942_v47 = vpop.f32.mrb[10].mxu1  ;;  %1788 = vtanh.f32 %v1716_v52 }
 0x232   :  { %v1717_v62 = vadd.f32 %v764_v61, %v586_v32  ;;  %v766_v49 = vpop.f32.mrb[11].mxu0  ;;  %v944_v63 = vpop.f32.mrb[11].mxu1  ;;  %1790 = vtanh.f32 %v1724_v31  ;;  %v1725_v46 = vadd.f32 %v942_v47, %v594_v0 }
 0x233   :  { %v1718_v59 = vadd.f32 %v766_v49, %v590_v50  ;;  %v1726_v1 = vadd.f32 %v944_v63, %v598_v53  ;;  %1792 = vtanh.f32 %v1723_v60 }
 0x234   :  { %1794 = vtanh.f32 %v1717_v62 }
 0x235   :  { %v770_v3 = vpop.f32.mrb[12].mxu0  ;;  %v948_v2 = vpop.f32.mrb[12].mxu1  ;;  %1796 = vtanh.f32 %v1718_v59 }
 0x236   :  { %v1719_v7 = vadd.f32 %v770_v3, %v586_v32  ;;  %v772_v8 = vpop.f32.mrb[13].mxu0  ;;  %v950_v9 = vpop.f32.mrb[13].mxu1  ;;  %1798 = vtanh.f32 %v1726_v1  ;;  %v1727_v5 = vadd.f32 %v948_v2, %v594_v0 }
 0x237   :  { %v1720_v6 = vadd.f32 %v772_v8, %v590_v50  ;;  %v1728_v51 = vadd.f32 %v950_v9, %v598_v53  ;;  %1800 = vtanh.f32 %v1725_v46 }
 0x238   :  { %1802 = vtanh.f32 %v1719_v7 }
 0x239   :  { %v776_v11 = vpop.f32.mrb[14].mxu0  ;;  %v954_v12 = vpop.f32.mrb[14].mxu1  ;;  %1804 = vtanh.f32 %v1720_v6 }
 0x23a   :  { %v1721_v13 = vadd.f32 %v776_v11, %v586_v32  ;;  %v778_v14 = vpop.f32.mrb[15].mxu0  ;;  %v956_v15 = vpop.f32.mrb[15].mxu1  ;;  %1806 = vtanh.f32 %v1728_v51  ;;  %v1729_v21 = vadd.f32 %v954_v12, %v594_v0 }
 0x23b   :  { %v1787_v16 = vpop.eup %1786  ;;  %v1722_v17 = vadd.f32 %v778_v14, %v590_v50  ;;  %v1730_v19 = vadd.f32 %v956_v15, %v598_v53  ;;  %1808 = vtanh.f32 %v1727_v5 }
 0x23c   :  { %v1789_v20 = vpop.eup %1788  ;;  %1810 = vtanh.f32 %v1721_v13 }
 0x23d   :  { %v1791_v22 = vpop.eup %1790  ;;  %1110 = vmatprep.mubr.f32.mxu0 %v1789_v20  ;;  %1812 = vtanh.f32 %v1722_v17 }
 0x23e   :  { %v1793_v23 = vpop.eup %1792  ;;  %1195 = vmatprep.mubr.f32.mxu1 %v1791_v22  ;;  %1111 = vmatmul.mubr.f32.vlgmr.msra.gmra.mrb[16].mxu0 %v1787_v16  ;;  %1814 = vtanh.f32 %v1730_v19 }
 0x23f   :  { %v1795_v24 = vpop.eup %1794  ;;  %1196 = vmatmul.mubr.f32.vlgmr.msra.gmra.mrb[16].mxu1 %v1793_v23  ;;  %1816 = vtanh.f32 %v1729_v21 }
 0x240   :  { %v1797_v4 = vpop.eup %1796 }
 0x241   :  { %v1799_v18 = vpop.eup %1798  ;;  %1115 = vmatprep.mubr.f32.mxu0 %v1797_v4 }
 0x242   :  { %v1801_v25 = vpop.eup %1800  ;;  %1200 = vmatprep.mubr.f32.mxu1 %v1799_v18  ;;  %1116 = vmatmul.mubr.f32.gmra.mrb[18].mxu0 %v1795_v24 }
 0x243   :  { %v1803_v26 = vpop.eup %1802  ;;  %1201 = vmatmul.mubr.f32.gmra.mrb[18].mxu1 %v1801_v25 }
 0x244   :  { %v1805_v27 = vpop.eup %1804 }
 0x245   :  { %v1807_v28 = vpop.eup %1806  ;;  %1120 = vmatprep.mubr.f32.mxu0 %v1805_v27 }
 0x246   :  { %v1809_v29 = vpop.eup %1808  ;;  %1205 = vmatprep.mubr.f32.mxu1 %v1807_v28  ;;  %1121 = vmatmul.mubr.f32.gmra.mrb[20].mxu0 %v1803_v26 }
 0x247   :  { %v1811_v30 = vpop.eup %1810  ;;  %1206 = vmatmul.mubr.f32.gmra.mrb[20].mxu1 %v1809_v29 }
 0x248   :  { %v1813_v33 = vpop.eup %1812 }
 0x249   :  { %v1815_v48 = vpop.eup %1814  ;;  %1125 = vmatprep.mubr.f32.mxu0 %v1813_v33 }
 0x24a   :  { %v1817_v34 = vpop.eup %1816  ;;  %1210 = vmatprep.mubr.f32.mxu1 %v1815_v48  ;;  %1126 = vmatmul.mubr.f32.gmra.mrb[22].mxu0 %v1811_v30 }
 0x24b   :  { %1211 = vmatmul.mubr.f32.gmra.mrb[22].mxu1 %v1817_v34 }
 0x311   :  { %v1275_v35 = vpop.f32.mrb[16].mxu0 }
 0x312   :  { %v1319_v36 = vpop.f32.mrb[16].mxu1  ;;  %v1276_v38 = vpop.f32.mrb[17].mxu0 }
 0x313   :  { %v1277_v39 = vadd.f32 %v1276_v38, %v1275_v35  ;;  %v1320_v40 = vpop.f32.mrb[17].mxu1 }
 0x314   :  { %v1321_v41 = vadd.f32 %v1320_v40, %v1319_v36 }
 0x315   :  { %v1113_v42 = vadd.f32 %v1277_v39, %v1242_v37  ;;  %v1278_v43 = vpop.f32.mrb[18].mxu0 }
 0x316   :  { %v1322_v44 = vpop.f32.mrb[18].mxu1  ;;  %v1279_v45 = vpop.f32.mrb[19].mxu0 }
 0x317   :  { %v1198_v10 = vadd.f32 %v1321_v41, %v1113_v42  ;;  %v1280_v32 = vadd.f32 %v1279_v45, %v1278_v43  ;;  %v1323_v50 = vpop.f32.mrb[19].mxu1 }
 0x318   :  { %v1324_v53 = vadd.f32 %v1323_v50, %v1322_v44 }
 0x319   :  { %1818 = vtanh.f32 %v1198_v10  ;;  %v1118_v0 = vadd.f32 %v1280_v32, %v1242_v37  ;;  %v1281_v54 = vpop.f32.mrb[20].mxu0 }
 0x31a   :  { %v1325_v55 = vpop.f32.mrb[20].mxu1  ;;  %v1282_v56 = vpop.f32.mrb[21].mxu0 }
 0x31b   :  { %v1203_v57 = vadd.f32 %v1324_v53, %v1118_v0  ;;  %v1283_v58 = vadd.f32 %v1282_v56, %v1281_v54  ;;  %v1326_v52 = vpop.f32.mrb[21].mxu1 }
 0x31c   :  { %v1327_v31 = vadd.f32 %v1326_v52, %v1325_v55 }
 0x31d   :  { %1820 = vtanh.f32 %v1203_v57  ;;  %v1123_v60 = vadd.f32 %v1283_v58, %v1242_v37  ;;  %v1284_v61 = vpop.f32.mrb[22].mxu0 }
 0x31e   :  { %v1328_v47 = vpop.f32.mrb[22].mxu1  ;;  %v1285_v62 = vpop.f32.mrb[23].mxu0 }
 0x31f   :  { %v1208_v49 = vadd.f32 %v1327_v31, %v1123_v60  ;;  %v1286_v63 = vadd.f32 %v1285_v62, %v1284_v61  ;;  %v1329_v59 = vpop.f32.mrb[23].mxu1 }
 0x320   :  { %v1330_v1 = vadd.f32 %v1329_v59, %v1328_v47 }
 0x321   :  { %1822 = vtanh.f32 %v1208_v49  ;;  %v1128_v46 = vadd.f32 %v1286_v63, %v1242_v37 }
 0x323   :  { %v1819_v3 = vpop.eup %1818  ;;  %v1213_v2 = vadd.f32 %v1330_v1, %v1128_v46 }
 0x324   :  { %1221 = vst.msk [vmem:[#allocation5] sm:$0xff] %vm1220_vm0, %v1819_v3 }
 0x325   :  { %1824 = vtanh.f32 %v1213_v2 }
 0x327   :  { %v1821_v7 = vpop.eup %1820 }
 0x328   :  { %1222 = vst.msk [vmem:[#allocation5 + $0x8] sm:$0xff] %vm1220_vm0, %v1821_v7 }
 0x32b   :  { %v1823_v8 = vpop.eup %1822 }
 0x32c   :  { %1223 = vst.msk [vmem:[#allocation5 + $0x10] sm:$0xff] %vm1220_vm0, %v1823_v8 }
 0x32f   :  { %v1825_v9 = vpop.eup %1824 }
 0x330   :  { %1224 = vst.msk [vmem:[#allocation5 + $0x18] sm:$0xff] %vm1220_vm0, %v1825_v9 }
 0x331   :  { %1859 = shalt.err (!%p1856_p12)
}
 0x332   :  { %s1860_s29 = scalar_lea.hbm %s2442_s7, 512 }
 0x333   :  { %p1861_p13 = scmp.ne.s32.totalorder %s2442_s7, %s1860_s29  ;;  %p1864_p0 = scmp.lt.u32.totalorder %s1860_s29, %s2442_s7 }
 0x335   :  { %p1866_p1 = pnand %p1864_p0, %p1861_p13 }
 0x337   :  { %1869 = shalt.err (!%p1866_p1)
}
 0x338   :  { %s1879_s10 = smov 128   ;;  %s1880_s11 = smov 8  }
 0x339   :  { %1236 = dma.vmem_to_hbm [thread:$0]  %s1231_s27, 512, %s2442_s7, [#allocation4], %s1879_s10, %s1879_s10, %s1880_s11  }
 0x33a   :  { %1872 = dma.done.wait [#allocation4], 512  }
 0x33b   :  { %1873 = vsyncadd [#allocation4], 4294966784 }
 0x33c   :  { %1240 = vsyncpa [#allocation3], 1 }
 0x33d   :  { %1241 = vsyncpa [#allocation4], 1 }

</bundles_post_ra>
